<compile_context>
chip_gen: v6e
topology: v6e:2x2x1
jax: 0.10.0
libtpu: 0.0.40
codegen_flags: <defaults>
</compile_context>

<pallas_src>
import functools
import math

import jax
import jax.numpy as jnp
from jax.experimental import pallas as pl
from jax.experimental.pallas import tpu as pltpu

_LANE = 128      # lane width (last dim)
_SUBLANE = 8     # sublane width (second-to-last dim)
_MIB = 1024 * 1024


def _round_up(n, m):
    return ((n + m - 1) // m) * m


def _cdiv(a, b):
    return -(-a // b)


def _apply_activation(y, activation):
    """Activation applied on the f32 accumulator. Matches PyTorch defaults."""
    if activation is None:
        return y
    if activation == "relu":
        return jnp.maximum(y, 0.0)
    if activation == "tanh":
        return jnp.tanh(y)
    if activation == "sigmoid":
        return jax.nn.sigmoid(y)
    if activation == "leaky_relu":
        return jnp.where(y >= 0.0, y, 0.01 * y)
    if activation == "elu":
        # exp only on the non-positive branch -> no overflow in the unselected lane.
        return jnp.where(y > 0.0, y, jnp.exp(jnp.minimum(y, 0.0)) - 1.0)
    raise ValueError(f"unsupported activation {activation}")


def _vmem_capacity_bytes():
    """Physical VMEM of the local TPU generation (fallback: 64 MiB, the v7x size)."""
    try:
        return int(pltpu.get_tpu_info().vmem_capacity_bytes)
    except Exception:
        return 64 * _MIB


def _fused_mlp_kernel(*refs, activations, stream_flags, layer_dims, stream_tks, mxu_dtype):
    """Fused MLP forward for one batch tile.

    refs = (x, w0, b0, w1, b1, ..., o[, wbuf, sem])
    Layers with stream_flags[l] = False get their (padded) weight as a VMEM-resident block;
    streamed layers get a raw HBM ref and their weight is DMA'd in K-tiles into `wbuf`
    (double-buffered) while accumulating into an f32 register tile.
    """
    n_layers = len(activations)
    x_ref = refs[0]
    o_ref = refs[1 + 2 * n_layers]
    any_stream = any(stream_flags)
    if any_stream:
        wbuf = refs[2 + 2 * n_layers]   # VMEM (2, tk_max, n_max) in weight dtype
        sem = refs[3 + 2 * n_layers]    # DMA semaphores (2,)

    h = x_ref[...].astype(jnp.float32)
    for l, act in enumerate(activations):
        w_ref = refs[1 + 2 * l]
        b = refs[2 + 2 * l][...].astype(jnp.float32)   # (1, d_out) broadcasts over rows
        d_in, d_out = layer_dims[l]

        if not stream_flags[l]:
            # Resident weight: single whole-tile MXU matmul (bf16 in, f32 accumulate).
            y = jnp.dot(h.astype(mxu_dtype), w_ref[...].astype(mxu_dtype),
                        preferred_element_type=jnp.float32)
        else:
            # Streamed weight: K-tiled, manually double-buffered DMA from HBM.
            tk = stream_tks[l]
            nk = d_in // tk

            def _copy(kidx, slot, w_ref=w_ref, tk=tk, d_out=d_out):
                return pltpu.make_async_copy(
                    w_ref.at[kidx * tk:(kidx + 1) * tk, :],
                    wbuf.at[slot, 0:tk, 0:d_out],
                    sem.at[slot])

            _copy(0, 0).start()
            y = jnp.zeros((h.shape[0], d_out), jnp.float32)
            for kidx in range(nk):                       # static unroll
                slot = kidx & 1
                _copy(kidx, slot).wait()
                if kidx + 1 < nk:
                    _copy(kidx + 1, 1 - slot).start()    # prefetch next K-tile
                h_k = h[:, kidx * tk:(kidx + 1) * tk].astype(mxu_dtype)
                w_k = wbuf[slot, 0:tk, 0:d_out].astype(mxu_dtype)
                y = y + jnp.dot(h_k, w_k, preferred_element_type=jnp.float32)

        h = _apply_activation(y + b, act)

    o_ref[...] = h.astype(o_ref.dtype)


def fused_mlp_forward(x, weights_padded, biases_padded, layer_sizes, padded_sizes,
                      activation, mxu_dtype, max_resident_param_bytes=None):
    """Run the whole MLP as a single pallas_call.  Returns (B, layer_sizes[-1])."""
    B, D_in = x.shape
    assert D_in == layer_sizes[0], (D_in, layer_sizes[0])
    n_layers = len(weights_padded)

    d_in_pad = padded_sizes[0]
    d_out = layer_sizes[-1]
    d_out_pad = padded_sizes[-1]
    io_itemsize = jnp.dtype(x.dtype).itemsize
    w_itemsize = jnp.dtype(weights_padded[0].dtype).itemsize

    vmem_budget = int(_vmem_capacity_bytes() * 0.8)   # ~102 MiB v5e/v6e, ~51 MiB v7x

    # ---- decide which layer weights stay VMEM-resident vs stream from HBM. ----
    w_bytes = [int(w.size) * w_itemsize for w in weights_padded]
    b_bytes = [int(b.size) * 4 for b in biases_padded]
    bias_total = sum(b_bytes)
    resident_budget = (max_resident_param_bytes if max_resident_param_bytes is not None
                       else int(vmem_budget * 0.6))
    stream_flags = [False] * n_layers
    resident_w = sum(w_bytes)
    for l in sorted(range(n_layers), key=lambda i: -w_bytes[i]):
        if resident_w + bias_total <= resident_budget:
            break
        stream_flags[l] = True
        resident_w -= w_bytes[l]
    any_stream = any(stream_flags)

    # K-tile for each streamed layer: largest of {512,384,256,128} dividing padded fan_in.
    stream_tks = [0] * n_layers
    for l in range(n_layers):
        if stream_flags[l]:
            din_p = padded_sizes[l]
            stream_tks[l] = next((c for c in (512, 384, 256, 128) if din_p % c == 0), din_p)

    stream_buf_bytes = 0
    tk_max = n_max = 0
    if any_stream:
        tk_max = max(stream_tks[l] for l in range(n_layers) if stream_flags[l])
        n_max = max(padded_sizes[l + 1] for l in range(n_layers) if stream_flags[l])
        stream_buf_bytes = 2 * tk_max * n_max * w_itemsize

    resident_param_bytes = resident_w + bias_total

    # ---- batch tile selection (minimize padding waste, keep >= 2 steps for megacore). ----
    pair_max = max(padded_sizes[i] + padded_sizes[i + 1] for i in range(n_layers))
    act_row_bytes = 4 * pair_max + 2 * io_itemsize * (d_in_pad + d_out_pad)
    headroom = max(vmem_budget - resident_param_bytes - stream_buf_bytes, 4 * _MIB)

    max_tb = 1024
    while max_tb > _SUBLANE and max_tb * act_row_bytes > headroom:
        max_tb //= 2
    max_tb = max(min(max_tb, 1024), _SUBLANE)

    n_steps = max(1, _cdiv(B, max_tb))
    if n_steps == 1 and B >= 2 * _SUBLANE:
        n_steps = 2                       # let "parallel" batch axis split across 2 TCs (v7x)
    tb = _round_up(_cdiv(B, n_steps), _SUBLANE)
    n_steps = _cdiv(B, tb)
    b_span = tb * n_steps

    # ---- input padding: avoid host-side copies when lanes are already aligned. ----
    ragged = (b_span != B)
    if d_in_pad != D_in:
        # Must lane-pad: do the row padding in the same single copy.
        x_p = jnp.zeros((b_span, d_in_pad), dtype=x.dtype).at[:B, :D_in].set(x)
        out_rows = b_span
    elif ragged and B < _SUBLANE:
        # Tiny batch: cheap row pad keeps the single block full.
        x_p = jnp.pad(x, ((0, b_span - B), (0, 0)))
        out_rows = b_span
    else:
        # Lane-aligned input: no extra HBM copy; Pallas masks the ragged last tile.
        x_p = x
        out_rows = B

    activations = tuple(activation if i < n_layers - 1 else None for i in range(n_layers))
    kernel = functools.partial(
        _fused_mlp_kernel,
        activations=activations,
        stream_flags=tuple(stream_flags),
        layer_dims=tuple((padded_sizes[l], padded_sizes[l + 1]) for l in range(n_layers)),
        stream_tks=tuple(stream_tks),
        mxu_dtype=mxu_dtype,
    )

    params = []
    for w, b in zip(weights_padded, biases_padded):
        params.append(w)
        params.append(b)

    scratch_shapes = []
    if any_stream:
        scratch_shapes = [pltpu.VMEM((2, tk_max, n_max), weights_padded[0].dtype),
                          pltpu.SemaphoreType.DMA((2,))]

    def _build_specs(single_buffer_params):
        def _resident(shape):
            if single_buffer_params:
                return pl.BlockSpec(shape, lambda i: (0, 0), pipeline_mode=pl.Buffered(1))
            return pl.BlockSpec(shape, lambda i: (0, 0))

        in_specs = [pl.BlockSpec((tb, d_in_pad), lambda i: (i, 0))]
        for l in range(n_layers):
            if stream_flags[l]:
                in_specs.append(pl.BlockSpec(memory_space=pl.ANY))   # raw HBM ref
            else:
                in_specs.append(_resident(weights_padded[l].shape))
            in_specs.append(_resident(biases_padded[l].shape))
        out_specs = pl.BlockSpec((tb, d_out_pad), lambda i: (i, 0))
        return in_specs, out_specs

    # VMEM budget pieces (actual itemsizes; two live f32 intermediates).
    io_bytes = 2 * tb * (d_in_pad + d_out_pad) * io_itemsize
    interm_bytes = tb * pair_max * 4

    # Advisory cost estimate so XLA can overlap the custom call with neighboring HLO.
    flops = 2 * b_span * sum(padded_sizes[i] * padded_sizes[i + 1] for i in range(n_layers))
    transcendentals = (b_span * sum(padded_sizes[1:-1])
                       if activation in ("tanh", "sigmoid", "elu") and n_layers > 1 else 0)
    param_read_bytes = sum(w_bytes[l] * (n_steps if stream_flags[l] else 1)
                           for l in range(n_layers)) + bias_total
    bytes_accessed = (int(x_p.size) * io_itemsize
                      + out_rows * d_out_pad * io_itemsize + param_read_bytes)

    def _run(single_buffer_params):
        in_specs, out_specs = _build_specs(single_buffer_params)
        mult = 1 if single_buffer_params else 2
        needed = (resident_param_bytes * mult + io_bytes + interm_bytes
                  + stream_buf_bytes + 2 * _MIB)
        vmem_limit = int(min(vmem_budget, max(needed, 16 * _MIB)))
        return pl.pallas_call(
            kernel,
            out_shape=jax.ShapeDtypeStruct((out_rows, d_out_pad), x.dtype),
            grid=(n_steps,),
            in_specs=in_specs,
            out_specs=out_specs,
            scratch_shapes=scratch_shapes,
            compiler_params=pltpu.CompilerParams(
                dimension_semantics=("parallel",),
                vmem_limit_bytes=vmem_limit,
            ),
            cost_estimate=pl.CostEstimate(
                flops=flops, transcendentals=transcendentals,
                bytes_accessed=bytes_accessed),
        )(x_p, *params)

    try:
        out = _run(single_buffer_params=True)
    except Exception:
        # pipeline_mode=pl.Buffered(1) not supported by this jax build -> default buffering.
        out = _run(single_buffer_params=False)

    return out[:B, :d_out]


class ParametricFullyConnectedPallas:
    """JAX/Pallas port of the PyTorch ParametricFullyConnected module (forward pass)."""

    AVAILABLE_ACTIVATIONS = ("relu", "tanh", "sigmoid", "leaky_relu", "elu")

    def __init__(self, layer_sizes, activation="relu", key=None, dtype=jnp.float32,
                 mxu_dtype=jnp.bfloat16, max_resident_param_bytes=None):
        if len(layer_sizes) < 2:
            raise ValueError("dims must contain at least 2 dimensions (input and output)")
        activation = activation.lower()
        if activation not in self.AVAILABLE_ACTIVATIONS:
            raise ValueError(f"Unsupported activation function: {activation}")
        self.activation = activation
        self.layer_sizes = list(layer_sizes)
        self.dtype = jnp.dtype(dtype)
        self.mxu_dtype = jnp.dtype(mxu_dtype)      # MXU input / padded-weight storage dtype
        self.max_resident_param_bytes = max_resident_param_bytes
        if key is None:
            key = jax.random.PRNGKey(0)

        # Lane-padded layer widths (multiples of 128).
        self.padded_sizes = [_round_up(d, _LANE) for d in layer_sizes]

        # nn.Linear-style init: U(-1/sqrt(fan_in), 1/sqrt(fan_in)).
        # Weights stored as (fan_in, fan_out) so the kernel computes y = x @ W + b.
        self.weights = []          # unpadded f32 masters (for reference / inspection)
        self.biases = []
        self.weights_padded = []   # zero-padded, stored in mxu_dtype
        self.biases_padded = []    # zero-padded, kept in f32 (tiny)
        for i in range(len(layer_sizes) - 1):
            fan_in, fan_out = layer_sizes[i], layer_sizes[i + 1]
            fan_in_p, fan_out_p = self.padded_sizes[i], self.padded_sizes[i + 1]
            key, wk, bk = jax.random.split(key, 3)
            bound = 1.0 / math.sqrt(fan_in)
            w = jax.random.uniform(wk, (fan_in, fan_out), jnp.float32, -bound, bound)
            b = jax.random.uniform(bk, (1, fan_out), jnp.float32, -bound, bound)
            self.weights.append(w)
            self.biases.append(b)
            w_p = jnp.zeros((fan_in_p, fan_out_p), self.mxu_dtype
                            ).at[:fan_in, :fan_out].set(w.astype(self.mxu_dtype))
            b_p = jnp.zeros((1, fan_out_p), jnp.float32).at[:, :fan_out].set(b)
            self.weights_padded.append(w_p)
            self.biases_padded.append(b_p)

    def get_num_parameters(self):
        return sum(int(w.size) + int(b.size) for w, b in zip(self.weights, self.biases))

    def __call__(self, x):
        # Flatten any trailing dims: (B, ...) -> (B, prod(...))
        if x.ndim > 2:
            x = x.reshape(x.shape[0], -1)
        return fused_mlp_forward(
            x,
            self.weights_padded,
            self.biases_padded,
            self.layer_sizes,
            self.padded_sizes,
            self.activation,
            self.mxu_dtype,
            self.max_resident_param_bytes,
        )


def _reference_forward(model, x):
    """Plain-JAX reference mirroring the kernel numerics (same mxu_dtype casts)."""
    if x.ndim > 2:
        x = x.reshape(x.shape[0], -1)
    n = len(model.weights)
    h = x.astype(jnp.float32)
    for i, (w, b) in enumerate(zip(model.weights, model.biases)):
        y = jnp.dot(h.astype(model.mxu_dtype), w.astype(model.mxu_dtype),
                    preferred_element_type=jnp.float32) + b.astype(jnp.float32)
        h = _apply_activation(y, model.activation) if i < n - 1 else y
    return h.astype(x.dtype)


if __name__ == "__main__":
    key = jax.random.PRNGKey(0)
    xkey, k1, k2, k3, k4, xkey2 = jax.random.split(key, 6)

    # Input like an image batch that the module flattens: (2, 4, 16, 16) -> (2, 1024)
    x = jax.random.normal(xkey, (2, 4, 16, 16), dtype=jnp.float32)
    layer_sizes = [4 * 16 * 16, 128, 64, 32]

    # Check 1: exact-parity f32 MXU path, relu (default activation).
    m_f32 = ParametricFullyConnectedPallas(layer_sizes, activation="relu", key=k1,
                                           mxu_dtype=jnp.float32)
    out = jax.block_until_ready(m_f32(x))
    ref = _reference_forward(m_f32, x)
    assert out.shape == (2, 32), out.shape
    assert jnp.allclose(out, ref, atol=1e-5, rtol=1e-5), "f32 relu mismatch vs reference"

    # Check 2: default bf16-MXU path, sigmoid (act(0) != 0 exercises padded-lane cancellation).
    m_bf16 = ParametricFullyConnectedPallas(layer_sizes, activation="sigmoid", key=k2)
    out2 = jax.block_until_ready(m_bf16(x))
    ref2 = _reference_forward(m_bf16, x)
    assert jnp.allclose(out2, ref2, atol=2e-3, rtol=2e-3), "bf16 sigmoid mismatch vs reference"

    # Check 3: multi-step parallel grid + ragged (non-divisible) batch with no host-side x copy.
    xb = jax.random.normal(xkey2, (520, 256), dtype=jnp.float32)
    m3 = ParametricFullyConnectedPallas([256, 192, 96, 40], activation="elu", key=k3)
    out3 = jax.block_until_ready(m3(xb))
    ref3 = _reference_forward(m3, xb)
    assert out3.shape == (520, 40), out3.shape
    assert jnp.allclose(out3, ref3, atol=2e-3, rtol=2e-3), "ragged/grid mismatch vs reference"

    # Check 4: forced HBM weight streaming (the large-layer fallback path), tanh hidden.
    m4 = ParametricFullyConnectedPallas([1024, 512, 64], activation="tanh", key=k4,
                                        max_resident_param_bytes=0)
    x4 = jax.random.normal(jax.random.PRNGKey(7), (64, 1024), dtype=jnp.float32)
    out4 = jax.block_until_ready(m4(x4))
    ref4 = _reference_forward(m4, x4)
    assert out4.shape == (64, 64), out4.shape
    assert jnp.allclose(out4, ref4, atol=2e-3, rtol=2e-3), "streamed-weight mismatch vs reference"

    print("KERNEL_OK")
</pallas_src>

<mosaic_0001>
module attributes {stable_mosaic.version = 11 : i64} {
  func.func @_fused_mlp_kernel(%arg0: i32, %arg1: memref<8x1024xf32, #tpu.memory_space<vmem>>, %arg2: memref<1024x128xf32, #tpu.memory_space<vmem>>, %arg3: memref<1x128xf32, #tpu.memory_space<vmem>>, %arg4: memref<128x128xf32, #tpu.memory_space<vmem>>, %arg5: memref<1x128xf32, #tpu.memory_space<vmem>>, %arg6: memref<128x128xf32, #tpu.memory_space<vmem>>, %arg7: memref<1x128xf32, #tpu.memory_space<vmem>>, %arg8: memref<8x128xf32, #tpu.memory_space<vmem>>) attributes {dimension_semantics = [#tpu.dimension_semantics<parallel>], iteration_bounds = array<i64: 1>, scalar_prefetch = 0 : i64, scratch_operands = 0 : i64, tpu.core_type = #tpu.core_type<tc>, window_params = [{transform_indices = @transform_0, window_bounds = array<i64: 8, 1024>}, {pipeline_mode = #tpu.pipeline_mode<synchronous>, transform_indices = @transform_1, window_bounds = array<i64: 1024, 128>}, {pipeline_mode = #tpu.pipeline_mode<synchronous>, transform_indices = @transform_2, window_bounds = array<i64: 1, 128>}, {pipeline_mode = #tpu.pipeline_mode<synchronous>, transform_indices = @transform_3, window_bounds = array<i64: 128, 128>}, {pipeline_mode = #tpu.pipeline_mode<synchronous>, transform_indices = @transform_4, window_bounds = array<i64: 1, 128>}, {pipeline_mode = #tpu.pipeline_mode<synchronous>, transform_indices = @transform_5, window_bounds = array<i64: 128, 128>}, {pipeline_mode = #tpu.pipeline_mode<synchronous>, transform_indices = @transform_6, window_bounds = array<i64: 1, 128>}, {transform_indices = @transform_7, window_bounds = array<i64: 8, 128>}]} {
    %c0 = arith.constant 0 : index
    %c0_0 = arith.constant 0 : index
    %0 = vector.load %arg1[%c0, %c0_0] : memref<8x1024xf32, #tpu.memory_space<vmem>>, vector<8x1024xf32>
    %c0_1 = arith.constant 0 : index
    %c0_2 = arith.constant 0 : index
    %1 = vector.load %arg3[%c0_1, %c0_2] : memref<1x128xf32, #tpu.memory_space<vmem>>, vector<1x128xf32>
    %c0_3 = arith.constant 0 : index
    %c0_4 = arith.constant 0 : index
    %2 = vector.load %arg2[%c0_3, %c0_4] : memref<1024x128xf32, #tpu.memory_space<vmem>>, vector<1024x128xf32>
    %cst = arith.constant dense<0.000000e+00> : vector<8x128xf32>
    %3 = tpu.matmul %0, %2, %cst {dimension_numbers = #tpu.dot_dimension_numbers<[1], [0], [0], [1], [0, 0, 1, 1], [], []>} : vector<8x1024xf32>, vector<1024x128xf32>, vector<8x128xf32> -> vector<8x128xf32>
    %4 = vector.broadcast %1 : vector<1x128xf32> to vector<8x128xf32>
    %5 = arith.addf %3, %4 : vector<8x128xf32>
    %cst_5 = arith.constant 0.000000e+00 : f32
    %6 = vector.broadcast %cst_5 : f32 to vector<8x128xf32>
    %7 = arith.maximumf %5, %6 : vector<8x128xf32>
    %c0_6 = arith.constant 0 : index
    %c0_7 = arith.constant 0 : index
    %8 = vector.load %arg5[%c0_6, %c0_7] : memref<1x128xf32, #tpu.memory_space<vmem>>, vector<1x128xf32>
    %c0_8 = arith.constant 0 : index
    %c0_9 = arith.constant 0 : index
    %9 = vector.load %arg4[%c0_8, %c0_9] : memref<128x128xf32, #tpu.memory_space<vmem>>, vector<128x128xf32>
    %cst_10 = arith.constant dense<0.000000e+00> : vector<8x128xf32>
    %10 = tpu.matmul %7, %9, %cst_10 {dimension_numbers = #tpu.dot_dimension_numbers<[1], [0], [0], [1], [0, 0, 1, 1], [], []>} : vector<8x128xf32>, vector<128x128xf32>, vector<8x128xf32> -> vector<8x128xf32>
    %11 = vector.broadcast %8 : vector<1x128xf32> to vector<8x128xf32>
    %12 = arith.addf %10, %11 : vector<8x128xf32>
    %cst_11 = arith.constant 0.000000e+00 : f32
    %13 = vector.broadcast %cst_11 : f32 to vector<8x128xf32>
    %14 = arith.maximumf %12, %13 : vector<8x128xf32>
    %c0_12 = arith.constant 0 : index
    %c0_13 = arith.constant 0 : index
    %15 = vector.load %arg7[%c0_12, %c0_13] : memref<1x128xf32, #tpu.memory_space<vmem>>, vector<1x128xf32>
    %c0_14 = arith.constant 0 : index
    %c0_15 = arith.constant 0 : index
    %16 = vector.load %arg6[%c0_14, %c0_15] : memref<128x128xf32, #tpu.memory_space<vmem>>, vector<128x128xf32>
    %cst_16 = arith.constant dense<0.000000e+00> : vector<8x128xf32>
    %17 = tpu.matmul %14, %16, %cst_16 {dimension_numbers = #tpu.dot_dimension_numbers<[1], [0], [0], [1], [0, 0, 1, 1], [], []>} : vector<8x128xf32>, vector<128x128xf32>, vector<8x128xf32> -> vector<8x128xf32>
    %18 = vector.broadcast %15 : vector<1x128xf32> to vector<8x128xf32>
    %19 = arith.addf %17, %18 : vector<8x128xf32>
    %c0_17 = arith.constant 0 : index
    %c0_18 = arith.constant 0 : index
    %20 = vector.load %arg8[%c0_17, %c0_18] : memref<8x128xf32, #tpu.memory_space<vmem>>, vector<8x128xf32>
    tpu.vector_store %arg8[%c0_17, %c0_18], %19 {strides = array<i32>} : memref<8x128xf32, #tpu.memory_space<vmem>>, vector<8x128xf32>,
    return
  }
  func.func @transform_0(%arg0: i32) -> (i32, i32) {
    %c0_i32 = arith.constant 0 : i32
    %c0_i32_0 = arith.constant 0 : i32
    return %arg0, %c0_i32 : i32, i32
  }
  func.func @transform_1(%arg0: i32) -> (i32, i32) {
    %c0_i32 = arith.constant 0 : i32
    %c0_i32_0 = arith.constant 0 : i32
    %c0_i32_1 = arith.constant 0 : i32
    return %c0_i32, %c0_i32_0 : i32, i32
  }
  func.func @transform_2(%arg0: i32) -> (i32, i32) {
    %c0_i32 = arith.constant 0 : i32
    %c0_i32_0 = arith.constant 0 : i32
    %c0_i32_1 = arith.constant 0 : i32
    return %c0_i32, %c0_i32_0 : i32, i32
  }
  func.func @transform_3(%arg0: i32) -> (i32, i32) {
    %c0_i32 = arith.constant 0 : i32
    %c0_i32_0 = arith.constant 0 : i32
    %c0_i32_1 = arith.constant 0 : i32
    return %c0_i32, %c0_i32_0 : i32, i32
  }
  func.func @transform_4(%arg0: i32) -> (i32, i32) {
    %c0_i32 = arith.constant 0 : i32
    %c0_i32_0 = arith.constant 0 : i32
    %c0_i32_1 = arith.constant 0 : i32
    return %c0_i32, %c0_i32_0 : i32, i32
  }
  func.func @transform_5(%arg0: i32) -> (i32, i32) {
    %c0_i32 = arith.constant 0 : i32
    %c0_i32_0 = arith.constant 0 : i32
    %c0_i32_1 = arith.constant 0 : i32
    return %c0_i32, %c0_i32_0 : i32, i32
  }
  func.func @transform_6(%arg0: i32) -> (i32, i32) {
    %c0_i32 = arith.constant 0 : i32
    %c0_i32_0 = arith.constant 0 : i32
    %c0_i32_1 = arith.constant 0 : i32
    return %c0_i32, %c0_i32_0 : i32, i32
  }
  func.func @transform_7(%arg0: i32) -> (i32, i32) {
    %c0_i32 = arith.constant 0 : i32
    %c0_i32_0 = arith.constant 0 : i32
    return %arg0, %c0_i32 : i32, i32
  }
}

module attributes {stable_mosaic.version = 11 : i64} {
  func.func @_fused_mlp_kernel(%arg0: i32, %arg1: memref<8x1024xf32, #tpu.memory_space<vmem>>, %arg2: memref<1024x128xf32, #tpu.memory_space<vmem>>, %arg3: memref<1x128xf32, #tpu.memory_space<vmem>>, %arg4: memref<128x128xf32, #tpu.memory_space<vmem>>, %arg5: memref<1x128xf32, #tpu.memory_space<vmem>>, %arg6: memref<128x128xf32, #tpu.memory_space<vmem>>, %arg7: memref<1x128xf32, #tpu.memory_space<vmem>>, %arg8: memref<8x128xf32, #tpu.memory_space<vmem>>) attributes {dimension_semantics = [#tpu.dimension_semantics<parallel>], iteration_bounds = array<i64: 1>, scalar_prefetch = 0 : i64, scratch_operands = 0 : i64, tpu.core_type = #tpu.core_type<tc>, window_params = [{transform_indices = @transform_0, window_bounds = array<i64: 8, 1024>}, {pipeline_mode = #tpu.pipeline_mode<synchronous>, transform_indices = @transform_1, window_bounds = array<i64: 1024, 128>}, {pipeline_mode = #tpu.pipeline_mode<synchronous>, transform_indices = @transform_2, window_bounds = array<i64: 1, 128>}, {pipeline_mode = #tpu.pipeline_mode<synchronous>, transform_indices = @transform_3, window_bounds = array<i64: 128, 128>}, {pipeline_mode = #tpu.pipeline_mode<synchronous>, transform_indices = @transform_4, window_bounds = array<i64: 1, 128>}, {pipeline_mode = #tpu.pipeline_mode<synchronous>, transform_indices = @transform_5, window_bounds = array<i64: 128, 128>}, {pipeline_mode = #tpu.pipeline_mode<synchronous>, transform_indices = @transform_6, window_bounds = array<i64: 1, 128>}, {transform_indices = @transform_7, window_bounds = array<i64: 8, 128>}]} {
    %c0 = arith.constant 0 : index
    %c0_0 = arith.constant 0 : index
    %0 = vector.load %arg1[%c0, %c0_0] : memref<8x1024xf32, #tpu.memory_space<vmem>>, vector<8x1024xf32>
    %c0_1 = arith.constant 0 : index
    %c0_2 = arith.constant 0 : index
    %1 = vector.load %arg3[%c0_1, %c0_2] : memref<1x128xf32, #tpu.memory_space<vmem>>, vector<1x128xf32>
    %c0_3 = arith.constant 0 : index
    %c0_4 = arith.constant 0 : index
    %2 = vector.load %arg2[%c0_3, %c0_4] : memref<1024x128xf32, #tpu.memory_space<vmem>>, vector<1024x128xf32>
    %cst = arith.constant dense<0.000000e+00> : vector<8x128xf32>
    %3 = tpu.matmul %0, %2, %cst {dimension_numbers = #tpu.dot_dimension_numbers<[1], [0], [0], [1], [0, 0, 1, 1], [], []>} : vector<8x1024xf32>, vector<1024x128xf32>, vector<8x128xf32> -> vector<8x128xf32>
    %4 = vector.broadcast %1 : vector<1x128xf32> to vector<8x128xf32>
    %5 = arith.addf %3, %4 : vector<8x128xf32>
    %cst_5 = arith.constant 0.000000e+00 : f32
    %6 = vector.broadcast %cst_5 : f32 to vector<8x128xf32>
    %7 = arith.maximumf %5, %6 : vector<8x128xf32>
    %c0_6 = arith.constant 0 : index
    %c0_7 = arith.constant 0 : index
    %8 = vector.load %arg5[%c0_6, %c0_7] : memref<1x128xf32, #tpu.memory_space<vmem>>, vector<1x128xf32>
    %c0_8 = arith.constant 0 : index
    %c0_9 = arith.constant 0 : index
    %9 = vector.load %arg4[%c0_8, %c0_9] : memref<128x128xf32, #tpu.memory_space<vmem>>, vector<128x128xf32>
    %cst_10 = arith.constant dense<0.000000e+00> : vector<8x128xf32>
    %10 = tpu.matmul %7, %9, %cst_10 {dimension_numbers = #tpu.dot_dimension_numbers<[1], [0], [0], [1], [0, 0, 1, 1], [], []>} : vector<8x128xf32>, vector<128x128xf32>, vector<8x128xf32> -> vector<8x128xf32>
    %11 = vector.broadcast %8 : vector<1x128xf32> to vector<8x128xf32>
    %12 = arith.addf %10, %11 : vector<8x128xf32>
    %cst_11 = arith.constant 0.000000e+00 : f32
    %13 = vector.broadcast %cst_11 : f32 to vector<8x128xf32>
    %14 = arith.maximumf %12, %13 : vector<8x128xf32>
    %c0_12 = arith.constant 0 : index
    %c0_13 = arith.constant 0 : index
    %15 = vector.load %arg7[%c0_12, %c0_13] : memref<1x128xf32, #tpu.memory_space<vmem>>, vector<1x128xf32>
    %c0_14 = arith.constant 0 : index
    %c0_15 = arith.constant 0 : index
    %16 = vector.load %arg6[%c0_14, %c0_15] : memref<128x128xf32, #tpu.memory_space<vmem>>, vector<128x128xf32>
    %cst_16 = arith.constant dense<0.000000e+00> : vector<8x128xf32>
    %17 = tpu.matmul %14, %16, %cst_16 {dimension_numbers = #tpu.dot_dimension_numbers<[1], [0], [0], [1], [0, 0, 1, 1], [], []>} : vector<8x128xf32>, vector<128x128xf32>, vector<8x128xf32> -> vector<8x128xf32>
    %18 = vector.broadcast %15 : vector<1x128xf32> to vector<8x128xf32>
    %19 = arith.addf %17, %18 : vector<8x128xf32>
    %c0_17 = arith.constant 0 : index
    %c0_18 = arith.constant 0 : index
    %20 = vector.load %arg8[%c0_17, %c0_18] : memref<8x128xf32, #tpu.memory_space<vmem>>, vector<8x128xf32>
    tpu.vector_store %arg8[%c0_17, %c0_18], %19 {strides = array<i32>} : memref<8x128xf32, #tpu.memory_space<vmem>>, vector<8x128xf32>,
    return
  }
  func.func @transform_0(%arg0: i32) -> (i32, i32) {
    %c0_i32 = arith.constant 0 : i32
    %c0_i32_0 = arith.constant 0 : i32
    return %arg0, %c0_i32 : i32, i32
  }
  func.func @transform_1(%arg0: i32) -> (i32, i32) {
    %c0_i32 = arith.constant 0 : i32
    %c0_i32_0 = arith.constant 0 : i32
    %c0_i32_1 = arith.constant 0 : i32
    return %c0_i32, %c0_i32_0 : i32, i32
  }
  func.func @transform_2(%arg0: i32) -> (i32, i32) {
    %c0_i32 = arith.constant 0 : i32
    %c0_i32_0 = arith.constant 0 : i32
    %c0_i32_1 = arith.constant 0 : i32
    return %c0_i32, %c0_i32_0 : i32, i32
  }
  func.func @transform_3(%arg0: i32) -> (i32, i32) {
    %c0_i32 = arith.constant 0 : i32
    %c0_i32_0 = arith.constant 0 : i32
    %c0_i32_1 = arith.constant 0 : i32
    return %c0_i32, %c0_i32_0 : i32, i32
  }
  func.func @transform_4(%arg0: i32) -> (i32, i32) {
    %c0_i32 = arith.constant 0 : i32
    %c0_i32_0 = arith.constant 0 : i32
    %c0_i32_1 = arith.constant 0 : i32
    return %c0_i32, %c0_i32_0 : i32, i32
  }
  func.func @transform_5(%arg0: i32) -> (i32, i32) {
    %c0_i32 = arith.constant 0 : i32
    %c0_i32_0 = arith.constant 0 : i32
    %c0_i32_1 = arith.constant 0 : i32
    return %c0_i32, %c0_i32_0 : i32, i32
  }
  func.func @transform_6(%arg0: i32) -> (i32, i32) {
    %c0_i32 = arith.constant 0 : i32
    %c0_i32_0 = arith.constant 0 : i32
    %c0_i32_1 = arith.constant 0 : i32
    return %c0_i32, %c0_i32_0 : i32, i32
  }
  func.func @transform_7(%arg0: i32) -> (i32, i32) {
    %c0_i32 = arith.constant 0 : i32
    %c0_i32_0 = arith.constant 0 : i32
    return %arg0, %c0_i32 : i32, i32
  }
}

</mosaic_0001>

<bundles_post_ra>
// kernel: tpu_custom_call.1
= control target key start
LH: loop header
LB: loop body
LE: loop exit
PB: predicated region body
PF: predicated region fallthrough
CT: control target
= control target key end

     0   :  { %12 = vsyncpa [#allocation3], 0  ;;  %s1189_s0 = inlined_call_operand.hbm [shape: f32[8,1024], index: 0, kind: input, shape index: {}]   ;;  %s1190_s1 = inlined_call_operand.hbm [shape: f32[1024,128], index: 1, kind: input, shape index: {}]   ;;  %s1191_s2 = inlined_call_operand.vmem [shape: f32[1,128], index: 2, kind: input, shape index: {}]   ;;  %s1192_s3 = inlined_call_operand.hbm [shape: f32[128,128], index: 3, kind: input, shape index: {}]   ;;  %s1193_s4 = inlined_call_operand.vmem [shape: f32[1,128], index: 4, kind: input, shape index: {}]   ;;  %s1194_s5 = inlined_call_operand.hbm [shape: f32[128,128], index: 5, kind: input, shape index: {}]   ;;  %s1195_s6 = inlined_call_operand.vmem [shape: f32[1,128], index: 6, kind: input, shape index: {}]   ;;  %s1196_s7 = inlined_call_operand.hbm [shape: f32[8,128], index: 7, kind: output, shape index: {}]  }
   0x1   :  { %13 = vsyncpa [#allocation6], 0 }
   0x2   :  { %14 = vsyncpa [#allocation9], 0 }
   0x3   :  { %15 = vsyncpa [#allocation4], 0  ;;  %s1073_s24 = smov [#allocation5]  }
   0x4   :  { %s31_s25 = sshll.u32 %s1073_s24, 4  ;;  %s32_s25 = int_to_ptr.vmem [resolvable:$true] %s31_s25 }
   0x5   :  { %s973_s26 = scalar_lea.vmem %s32_s25, 16384  ;;  %p978_p1 = scmp.lt.s32.totalorder %s32_s25, %s32_s25 }
   0x6   :  { %p974_p0 = scmp.ne.s32.totalorder %s32_s25, %s973_s26  ;;  %p979_p2 = scmp.lt.s32.totalorder %s973_s26, %s973_s26 }
   0x8   :  { %p980_p3 = por %p979_p2, %p978_p1 }
   0xa   :  { %p981_p4 = pnand %p980_p3, %p974_p0 }
   0xc   :  { %984 = shalt.err (!%p981_p4)
}
   0xd   :  { %s1074_s27 = smov 128   ;;  %s1075_s28 = smov 8  }
   0xe   :  { %37 = dma.hbm_to_vmem [thread:$0]  %s1190_s1, 16384, %s32_s25, [#allocation6], %s1074_s27, %s1074_s27, %s1075_s28  }
   0xf   :  { %s1076_s8 = smov [#allocation2]   ;;  %s1077_s10 = smov [#allocation7]  }
  0x10   :  { %s22_s9 = sshll.u32 %s1076_s8, 4  ;;  %s45_s11 = sshll.u32 %s1077_s10, 4  ;;  %s23_s9 = int_to_ptr.vmem [resolvable:$true] %s22_s9  ;;  %s46_s11 = int_to_ptr.vmem [resolvable:$true] %s45_s11 }
  0x11   :  { %s993_s12 = scalar_lea.vmem %s23_s9, 1024  ;;  %p998_p6 = scmp.lt.s32.totalorder %s23_s9, %s23_s9 }
  0x12   :  { %p994_p5 = scmp.ne.s32.totalorder %s23_s9, %s993_s12  ;;  %p999_p7 = scmp.lt.s32.totalorder %s993_s12, %s993_s12 }
  0x14   :  { %p1000_p8 = por %p999_p7, %p998_p6 }
  0x16   :  { %p1001_p9 = pnand %p1000_p8, %p994_p5 }
  0x18   :  { %1004 = shalt.err (!%p1001_p9)
}
  0x19   :  { %25 = dma.hbm_to_vmem [thread:$0]  %s1189_s0, 1024, %s23_s9, [#allocation3]  }
  0x1a   :  { %s1013_s15 = scalar_lea.vmem %s46_s11, 2048  ;;  %p1018_p11 = scmp.lt.s32.totalorder %s46_s11, %s46_s11 }
  0x1b   :  { %p1014_p10 = scmp.ne.s32.totalorder %s46_s11, %s1013_s15  ;;  %p1019_p12 = scmp.lt.s32.totalorder %s1013_s15, %s1013_s15 }
  0x1d   :  { %p1020_p13 = por %p1019_p12, %p1018_p11 }
  0x1f   :  { %p1021_p0 = pnand %p1020_p13, %p1014_p10 }
  0x21   :  { %1024 = shalt.err (!%p1021_p0)
}
  0x22   :  { %51 = dma.hbm_to_vmem [thread:$0]  %s1192_s3, 2048, %s46_s11, [#allocation6], %s1074_s27, %s1074_s27, %s1075_s28  }
  0x23   :  { %s1078_s17 = smov [#allocation8]  }
  0x24   :  { %s59_s18 = sshll.u32 %s1078_s17, 4  ;;  %s60_s18 = int_to_ptr.vmem [resolvable:$true] %s59_s18 }
  0x25   :  { %s1033_s19 = scalar_lea.vmem %s60_s18, 2048  ;;  %p1038_p2 = scmp.lt.s32.totalorder %s60_s18, %s60_s18 }
  0x26   :  { %p1034_p1 = scmp.ne.s32.totalorder %s60_s18, %s1033_s19  ;;  %p1039_p3 = scmp.lt.s32.totalorder %s1033_s19, %s1033_s19 }
  0x28   :  { %p1040_p4 = por %p1039_p3, %p1038_p2 }
  0x2a   :  { %p1041_p5 = pnand %p1040_p4, %p1034_p1 }
  0x2c   :  { %1044 = shalt.err (!%p1041_p5)
}
  0x2d   :  { %65 = dma.hbm_to_vmem [thread:$0]  %s1194_s5, 2048, %s60_s18, [#allocation9], %s1074_s27, %s1074_s27, %s1075_s28  }
  0x2e   :  { %1065 = dma.done.wait [#allocation3], 1024  }
  0x2f   :  { %1066 = vsyncadd [#allocation3], 4294966272 }
  0x30   :  { %1067 = dma.done.wait [#allocation6], 18432  }
  0x31   :  { %1068 = vsyncadd [#allocation6], 4294948864 }
  0x32   :  { %1069 = dma.done.wait [#allocation9], 2048  }
  0x33   :  { %1070 = vsyncadd [#allocation9], 4294965248  ;;  %v120_v0 = vld [vmem:[#allocation5 + $0xf8] sm:$0xff]  ;;  %v119_v4 = vld [vmem:[#allocation5 + $0xf0] sm:$0xff]  ;;  %vm1080_vm0 = vmmov 0   ;;  %s1081_s24 = smov [#allocation10]  }
  0x34   :  { %v152_v1 = vld [vmem:[#allocation5 + $0x1f8] sm:$0xff]  ;;  %712 = vmatprep.subr.mxu0 %v120_v0  ;;  %v151_v5 = vld [vmem:[#allocation5 + $0x1f0] sm:$0xff]  ;;  %v118_v8 = vld [vmem:[#allocation5 + $0xe8] sm:$0xff]  ;;  %s698_s25 = sshll.u32 %s1081_s24, 4  ;;  %s699_s25 = int_to_ptr.vmem [resolvable:$true] %s698_s25 }
  0x35   :  { %v104_v2 = vld [vmem:[#allocation5 + $0x78] sm:$0xff]  ;;  %747 = vmatprep.subr.mxu1 %v152_v1  ;;  %v103_v6 = vld [vmem:[#allocation5 + $0x70] sm:$0xff]  ;;  %v150_v9 = vld [vmem:[#allocation5 + $0x1e8] sm:$0xff]  ;;  %s1045_s26 = scalar_lea.vmem %s699_s25, 128  ;;  %p1050_p7 = scmp.lt.s32.totalorder %s699_s25, %s699_s25 }
  0x36   :  { %v136_v3 = vld [vmem:[#allocation5 + $0x178] sm:$0xff]  ;;  %713 = vmatpush3.msra.mxu0 %v104_v2  ;;  %v135_v7 = vld [vmem:[#allocation5 + $0x170] sm:$0xff]  ;;  %v102_v10 = vld [vmem:[#allocation5 + $0x68] sm:$0xff]  ;;  %p1046_p6 = scmp.ne.s32.totalorder %s699_s25, %s1045_s26  ;;  %p1051_p8 = scmp.lt.s32.totalorder %s1045_s26, %s1045_s26 }
  0x37   :  { %748 = vmatpush3.msra.mxu1 %v136_v3  ;;  %714 = vmatprep.subr.mxu0 %v119_v4  ;;  %v134_v11 = vld [vmem:[#allocation5 + $0x168] sm:$0xff]  ;;  %v117_v12 = vld [vmem:[#allocation5 + $0xe0] sm:$0xff]  ;;  %v116_v16 = vld [vmem:[#allocation5 + $0xd8] sm:$0xff] }
  0x38   :  { %749 = vmatprep.subr.mxu1 %v151_v5  ;;  %715 = vmatpush3.msra.mxu0 %v103_v6  ;;  %v149_v13 = vld [vmem:[#allocation5 + $0x1e0] sm:$0xff]  ;;  %v148_v17 = vld [vmem:[#allocation5 + $0x1d8] sm:$0xff]  ;;  %v115_v20 = vld [vmem:[#allocation5 + $0xd0] sm:$0xff]  ;;  %p1052_p9 = por %p1051_p8, %p1050_p7 }
  0x39   :  { %750 = vmatpush3.msra.mxu1 %v135_v7  ;;  %716 = vmatprep.subr.mxu0 %v118_v8  ;;  %v101_v14 = vld [vmem:[#allocation5 + $0x60] sm:$0xff]  ;;  %v100_v18 = vld [vmem:[#allocation5 + $0x58] sm:$0xff]  ;;  %v147_v21 = vld [vmem:[#allocation5 + $0x1d0] sm:$0xff] }
  0x3a   :  { %751 = vmatprep.subr.mxu1 %v150_v9  ;;  %v133_v15 = vld [vmem:[#allocation5 + $0x160] sm:$0xff]  ;;  %717 = vmatpush3.msra.mxu0 %v102_v10  ;;  %v132_v19 = vld [vmem:[#allocation5 + $0x158] sm:$0xff]  ;;  %v99_v22 = vld [vmem:[#allocation5 + $0x50] sm:$0xff]  ;;  %p1053_p10 = pnand %p1052_p9, %p1046_p6 }
  0x3b   :  { %752 = vmatpush3.msra.mxu1 %v134_v11  ;;  %718 = vmatprep.subr.mxu0 %v117_v12  ;;  %v131_v23 = vld [vmem:[#allocation5 + $0x150] sm:$0xff]  ;;  %v114_v24 = vld [vmem:[#allocation5 + $0xc8] sm:$0xff]  ;;  %v113_v28 = vld [vmem:[#allocation5 + $0xc0] sm:$0xff] }
  0x3c   :  { %753 = vmatprep.subr.mxu1 %v149_v13  ;;  %719 = vmatpush3.msra.mxu0 %v101_v14  ;;  %v146_v25 = vld [vmem:[#allocation5 + $0x1c8] sm:$0xff]  ;;  %v145_v29 = vld [vmem:[#allocation5 + $0x1c0] sm:$0xff]  ;;  %v112_v32 = vld [vmem:[#allocation5 + $0xb8] sm:$0xff] }
  0x3d   :  { %754 = vmatpush3.msra.mxu1 %v133_v15  ;;  %720 = vmatprep.subr.mxu0 %v116_v16  ;;  %v98_v26 = vld [vmem:[#allocation5 + $0x48] sm:$0xff]  ;;  %v97_v30 = vld [vmem:[#allocation5 + $0x40] sm:$0xff]  ;;  %v144_v33 = vld [vmem:[#allocation5 + $0x1b8] sm:$0xff] }
  0x3e   :  { %755 = vmatprep.subr.mxu1 %v148_v17  ;;  %721 = vmatpush3.msra.mxu0 %v100_v18  ;;  %v130_v27 = vld [vmem:[#allocation5 + $0x148] sm:$0xff]  ;;  %v129_v31 = vld [vmem:[#allocation5 + $0x140] sm:$0xff]  ;;  %v96_v34 = vld [vmem:[#allocation5 + $0x38] sm:$0xff] }
  0x3f   :  { %756 = vmatpush3.msra.mxu1 %v132_v19  ;;  %722 = vmatprep.subr.mxu0 %v115_v20  ;;  %v128_v35 = vld [vmem:[#allocation5 + $0x138] sm:$0xff]  ;;  %v111_v36 = vld [vmem:[#allocation5 + $0xb0] sm:$0xff]  ;;  %v110_v40 = vld [vmem:[#allocation5 + $0xa8] sm:$0xff] }
  0x40   :  { %757 = vmatprep.subr.mxu1 %v147_v21  ;;  %723 = vmatpush3.msra.mxu0 %v99_v22  ;;  %v143_v37 = vld [vmem:[#allocation5 + $0x1b0] sm:$0xff]  ;;  %v142_v41 = vld [vmem:[#allocation5 + $0x1a8] sm:$0xff]  ;;  %v109_v44 = vld [vmem:[#allocation5 + $0xa0] sm:$0xff] }
  0x41   :  { %758 = vmatpush3.msra.mxu1 %v131_v23  ;;  %724 = vmatprep.subr.mxu0 %v114_v24  ;;  %v95_v38 = vld [vmem:[#allocation5 + $0x30] sm:$0xff]  ;;  %v94_v42 = vld [vmem:[#allocation5 + $0x28] sm:$0xff]  ;;  %v141_v45 = vld [vmem:[#allocation5 + $0x1a0] sm:$0xff] }
  0x42   :  { %759 = vmatprep.subr.mxu1 %v146_v25  ;;  %725 = vmatpush3.msra.mxu0 %v98_v26  ;;  %v127_v39 = vld [vmem:[#allocation5 + $0x130] sm:$0xff]  ;;  %v126_v43 = vld [vmem:[#allocation5 + $0x128] sm:$0xff]  ;;  %v93_v46 = vld [vmem:[#allocation5 + $0x20] sm:$0xff] }
  0x43   :  { %760 = vmatpush3.msra.mxu1 %v130_v27  ;;  %726 = vmatprep.subr.mxu0 %v113_v28  ;;  %v125_v47 = vld [vmem:[#allocation5 + $0x120] sm:$0xff]  ;;  %v108_v48 = vld [vmem:[#allocation5 + $0x98] sm:$0xff]  ;;  %v107_v52 = vld [vmem:[#allocation5 + $0x90] sm:$0xff] }
  0x44   :  { %761 = vmatprep.subr.mxu1 %v145_v29  ;;  %727 = vmatpush3.msra.mxu0 %v97_v30  ;;  %v140_v49 = vld [vmem:[#allocation5 + $0x198] sm:$0xff]  ;;  %v139_v53 = vld [vmem:[#allocation5 + $0x190] sm:$0xff]  ;;  %v106_v56 = vld [vmem:[#allocation5 + $0x88] sm:$0xff] }
  0x45   :  { %762 = vmatpush3.msra.mxu1 %v129_v31  ;;  %728 = vmatprep.subr.mxu0 %v112_v32  ;;  %v92_v50 = vld [vmem:[#allocation5 + $0x18] sm:$0xff]  ;;  %v91_v54 = vld [vmem:[#allocation5 + $0x10] sm:$0xff]  ;;  %v138_v57 = vld [vmem:[#allocation5 + $0x188] sm:$0xff] }
  0x46   :  { %763 = vmatprep.subr.mxu1 %v144_v33  ;;  %729 = vmatpush3.msra.mxu0 %v96_v34  ;;  %v124_v51 = vld [vmem:[#allocation5 + $0x118] sm:$0xff]  ;;  %v123_v55 = vld [vmem:[#allocation5 + $0x110] sm:$0xff]  ;;  %v90_v58 = vld [vmem:[#allocation5 + $0x8] sm:$0xff] }
  0x47   :  { %764 = vmatpush3.msra.mxu1 %v128_v35  ;;  %730 = vmatprep.subr.mxu0 %v111_v36  ;;  %v122_v59 = vld [vmem:[#allocation5 + $0x108] sm:$0xff]  ;;  %v105_v60 = vld [vmem:[#allocation5 + $0x80] sm:$0xff]  ;;  %v83_v2 = vld [vmem:[#allocation2 + $0x18] sm:$0xff] }
  0x48   :  { %765 = vmatprep.subr.mxu1 %v143_v37  ;;  %731 = vmatpush3.msra.mxu0 %v95_v38  ;;  %v137_v61 = vld [vmem:[#allocation5 + $0x180] sm:$0xff]  ;;  %v81_v63 = vld [vmem:[#allocation2 + $0x8] sm:$0xff]  ;;  %v184_v3 = vld [vmem:[#allocation5 + $0x2f8] sm:$0xff] }
  0x49   :  { %766 = vmatpush3.msra.mxu1 %v127_v39  ;;  %732 = vmatprep.subr.mxu0 %v110_v40  ;;  %v89_v62 = vld [vmem:[#allocation5] sm:$0xff]  ;;  %v216_v4 = vld [vmem:[#allocation5 + $0x3f8] sm:$0xff]  ;;  %v82_v5 = vld [vmem:[#allocation2 + $0x10] sm:$0xff] }
  0x4a   :  { %767 = vmatprep.subr.mxu1 %v142_v41  ;;  %733 = vmatpush3.msra.mxu0 %v94_v42  ;;  %v121_v0 = vld [vmem:[#allocation5 + $0x100] sm:$0xff]  ;;  %v168_v6 = vld [vmem:[#allocation5 + $0x278] sm:$0xff]  ;;  %v183_v8 = vld [vmem:[#allocation5 + $0x2f0] sm:$0xff] }
  0x4b   :  { %768 = vmatpush3.msra.mxu1 %v126_v43  ;;  %734 = vmatprep.subr.mxu0 %v109_v44  ;;  %v80_v1 = vld [vmem:[#allocation2] sm:$0xff]  ;;  %v200_v7 = vld [vmem:[#allocation5 + $0x378] sm:$0xff]  ;;  %v215_v9 = vld [vmem:[#allocation5 + $0x3f0] sm:$0xff] }
  0x4c   :  { %769 = vmatprep.subr.mxu1 %v141_v45  ;;  %735 = vmatpush3.msra.mxu0 %v93_v46  ;;  %v167_v10 = vld [vmem:[#allocation5 + $0x270] sm:$0xff]  ;;  %v182_v12 = vld [vmem:[#allocation5 + $0x2e8] sm:$0xff]  ;;  %v181_v16 = vld [vmem:[#allocation5 + $0x2e0] sm:$0xff] }
  0x4d   :  { %770 = vmatpush3.msra.mxu1 %v125_v47  ;;  %736 = vmatprep.subr.mxu0 %v108_v48  ;;  %v199_v11 = vld [vmem:[#allocation5 + $0x370] sm:$0xff]  ;;  %v214_v13 = vld [vmem:[#allocation5 + $0x3e8] sm:$0xff]  ;;  %v213_v17 = vld [vmem:[#allocation5 + $0x3e0] sm:$0xff] }
  0x4e   :  { %771 = vmatprep.subr.mxu1 %v140_v49  ;;  %737 = vmatpush3.msra.mxu0 %v92_v50  ;;  %v166_v14 = vld [vmem:[#allocation5 + $0x268] sm:$0xff]  ;;  %v165_v18 = vld [vmem:[#allocation5 + $0x260] sm:$0xff]  ;;  %v180_v20 = vld [vmem:[#allocation5 + $0x2d8] sm:$0xff] }
  0x4f   :  { %772 = vmatpush3.msra.mxu1 %v124_v51  ;;  %738 = vmatprep.subr.mxu0 %v107_v52  ;;  %v198_v15 = vld [vmem:[#allocation5 + $0x368] sm:$0xff]  ;;  %v197_v19 = vld [vmem:[#allocation5 + $0x360] sm:$0xff]  ;;  %v212_v21 = vld [vmem:[#allocation5 + $0x3d8] sm:$0xff] }
  0x50   :  { %773 = vmatprep.subr.mxu1 %v139_v53  ;;  %739 = vmatpush3.msra.mxu0 %v91_v54  ;;  %v164_v22 = vld [vmem:[#allocation5 + $0x258] sm:$0xff]  ;;  %v179_v24 = vld [vmem:[#allocation5 + $0x2d0] sm:$0xff]  ;;  %v178_v28 = vld [vmem:[#allocation5 + $0x2c8] sm:$0xff] }
  0x51   :  { %774 = vmatpush3.msra.mxu1 %v123_v55  ;;  %740 = vmatprep.subr.mxu0 %v106_v56  ;;  %v196_v23 = vld [vmem:[#allocation5 + $0x358] sm:$0xff]  ;;  %v211_v25 = vld [vmem:[#allocation5 + $0x3d0] sm:$0xff]  ;;  %v210_v29 = vld [vmem:[#allocation5 + $0x3c8] sm:$0xff] }
  0x52   :  { %775 = vmatprep.subr.mxu1 %v138_v57  ;;  %741 = vmatpush3.msra.mxu0 %v90_v58  ;;  %v163_v26 = vld [vmem:[#allocation5 + $0x250] sm:$0xff]  ;;  %v162_v30 = vld [vmem:[#allocation5 + $0x248] sm:$0xff]  ;;  %v177_v32 = vld [vmem:[#allocation5 + $0x2c0] sm:$0xff] }
  0x53   :  { %776 = vmatpush3.msra.mxu1 %v122_v59  ;;  %742 = vmatprep.subr.mxu0 %v105_v60  ;;  %v195_v27 = vld [vmem:[#allocation5 + $0x350] sm:$0xff]  ;;  %v194_v31 = vld [vmem:[#allocation5 + $0x348] sm:$0xff]  ;;  %v209_v33 = vld [vmem:[#allocation5 + $0x3c0] sm:$0xff] }
  0x54   :  { %777 = vmatprep.subr.mxu1 %v137_v61  ;;  %743 = vmatpush3.msra.mxu0 %v89_v62  ;;  %v161_v34 = vld [vmem:[#allocation5 + $0x240] sm:$0xff]  ;;  %v176_v36 = vld [vmem:[#allocation5 + $0x2b8] sm:$0xff]  ;;  %v175_v40 = vld [vmem:[#allocation5 + $0x2b0] sm:$0xff] }
  0x55   :  { %287 = vmatprep.mubr.f32.mxu0 %v81_v63  ;;  %778 = vmatpush3.msra.mxu1 %v121_v0  ;;  %v193_v35 = vld [vmem:[#allocation5 + $0x340] sm:$0xff]  ;;  %v208_v37 = vld [vmem:[#allocation5 + $0x3b8] sm:$0xff]  ;;  %v207_v41 = vld [vmem:[#allocation5 + $0x3b0] sm:$0xff] }
  0x56   :  { %288 = vmatmul.mubr.f32.vlgmr.msra.gmra.mxu0 %v80_v1  ;;  %357 = vmatprep.mubr.f32.mxu1 %v83_v2  ;;  %v160_v38 = vld [vmem:[#allocation5 + $0x238] sm:$0xff]  ;;  %v159_v42 = vld [vmem:[#allocation5 + $0x230] sm:$0xff]  ;;  %v174_v44 = vld [vmem:[#allocation5 + $0x2a8] sm:$0xff] }
  0x57   :  { %782 = vmatprep.subr.mxu0 %v184_v3  ;;  %817 = vmatprep.subr.mxu1 %v216_v4  ;;  %v192_v39 = vld [vmem:[#allocation5 + $0x338] sm:$0xff]  ;;  %v191_v43 = vld [vmem:[#allocation5 + $0x330] sm:$0xff]  ;;  %v206_v45 = vld [vmem:[#allocation5 + $0x3a8] sm:$0xff] }
  0x58   :  { %358 = vmatmul.mubr.f32.vlgmr.msra.gmra.mxu1 %v82_v5  ;;  %783 = vmatpush3.msra.mxu0 %v168_v6  ;;  %v158_v46 = vld [vmem:[#allocation5 + $0x228] sm:$0xff]  ;;  %v173_v48 = vld [vmem:[#allocation5 + $0x2a0] sm:$0xff]  ;;  %v172_v52 = vld [vmem:[#allocation5 + $0x298] sm:$0xff] }
  0x59   :  { %818 = vmatpush3.msra.mxu1 %v200_v7  ;;  %784 = vmatprep.subr.mxu0 %v183_v8  ;;  %v190_v47 = vld [vmem:[#allocation5 + $0x328] sm:$0xff]  ;;  %v205_v49 = vld [vmem:[#allocation5 + $0x3a0] sm:$0xff]  ;;  %v204_v53 = vld [vmem:[#allocation5 + $0x398] sm:$0xff] }
  0x5a   :  { %819 = vmatprep.subr.mxu1 %v215_v9  ;;  %785 = vmatpush3.msra.mxu0 %v167_v10  ;;  %v157_v50 = vld [vmem:[#allocation5 + $0x220] sm:$0xff]  ;;  %v156_v54 = vld [vmem:[#allocation5 + $0x218] sm:$0xff]  ;;  %v171_v56 = vld [vmem:[#allocation5 + $0x290] sm:$0xff]  ;;  %v1079_v9 = vmov 0.0  }
  0x5b   :  { %820 = vmatpush3.msra.mxu1 %v199_v11  ;;  %786 = vmatprep.subr.mxu0 %v182_v12  ;;  %v189_v51 = vld [vmem:[#allocation5 + $0x320] sm:$0xff]  ;;  %v188_v55 = vld [vmem:[#allocation5 + $0x318] sm:$0xff]  ;;  %v203_v57 = vld [vmem:[#allocation5 + $0x390] sm:$0xff] }
  0x5c   :  { %821 = vmatprep.subr.mxu1 %v214_v13  ;;  %787 = vmatpush3.msra.mxu0 %v166_v14  ;;  %v155_v58 = vld [vmem:[#allocation5 + $0x210] sm:$0xff]  ;;  %v170_v60 = vld [vmem:[#allocation5 + $0x288] sm:$0xff]  ;;  %v169_v0 = vld [vmem:[#allocation5 + $0x280] sm:$0xff] }
  0x5d   :  { %822 = vmatpush3.msra.mxu1 %v198_v15  ;;  %788 = vmatprep.subr.mxu0 %v181_v16  ;;  %v187_v59 = vld [vmem:[#allocation5 + $0x310] sm:$0xff]  ;;  %v202_v61 = vld [vmem:[#allocation5 + $0x388] sm:$0xff]  ;;  %v201_v1 = vld [vmem:[#allocation5 + $0x380] sm:$0xff] }
  0x5e   :  { %823 = vmatprep.subr.mxu1 %v213_v17  ;;  %789 = vmatpush3.msra.mxu0 %v165_v18  ;;  %v154_v62 = vld [vmem:[#allocation5 + $0x208] sm:$0xff]  ;;  %v153_v2 = vld [vmem:[#allocation5 + $0x200] sm:$0xff]  ;;  %v87_v5 = vld [vmem:[#allocation2 + $0x38] sm:$0xff] }
  0x5f   :  { %824 = vmatpush3.msra.mxu1 %v197_v19  ;;  %790 = vmatprep.subr.mxu0 %v180_v20  ;;  %v186_v63 = vld [vmem:[#allocation5 + $0x308] sm:$0xff]  ;;  %v185_v4 = vld [vmem:[#allocation5 + $0x300] sm:$0xff]  ;;  %v86_v7 = vld [vmem:[#allocation2 + $0x30] sm:$0xff] }
  0x60   :  { %825 = vmatprep.subr.mxu1 %v212_v21  ;;  %791 = vmatpush3.msra.mxu0 %v164_v22  ;;  %v85_v3 = vld [vmem:[#allocation2 + $0x28] sm:$0xff]  ;;  %v84_v6 = vld [vmem:[#allocation2 + $0x20] sm:$0xff]  ;;  %v520_v8 = vld [vmem:[#allocation7 + $0x78] sm:$0xff] }
  0x61   :  { %826 = vmatpush3.msra.mxu1 %v196_v23  ;;  %792 = vmatprep.subr.mxu0 %v179_v24  ;;  %v519_v10 = vld [vmem:[#allocation7 + $0x70] sm:$0xff]  ;;  %v518_v11 = vld [vmem:[#allocation7 + $0x68] sm:$0xff]  ;;  %v517_v12 = vld [vmem:[#allocation7 + $0x60] sm:$0xff] }
  0x62   :  { %827 = vmatprep.subr.mxu1 %v211_v25  ;;  %793 = vmatpush3.msra.mxu0 %v163_v26  ;;  %v516_v13 = vld [vmem:[#allocation7 + $0x58] sm:$0xff]  ;;  %v515_v14 = vld [vmem:[#allocation7 + $0x50] sm:$0xff]  ;;  %v514_v15 = vld [vmem:[#allocation7 + $0x48] sm:$0xff] }
  0x63   :  { %828 = vmatpush3.msra.mxu1 %v195_v27  ;;  %794 = vmatprep.subr.mxu0 %v178_v28  ;;  %v513_v16 = vld [vmem:[#allocation7 + $0x40] sm:$0xff]  ;;  %v512_v17 = vld [vmem:[#allocation7 + $0x38] sm:$0xff]  ;;  %v511_v18 = vld [vmem:[#allocation7 + $0x30] sm:$0xff] }
  0x64   :  { %829 = vmatprep.subr.mxu1 %v210_v29  ;;  %795 = vmatpush3.msra.mxu0 %v162_v30  ;;  %v510_v19 = vld [vmem:[#allocation7 + $0x28] sm:$0xff]  ;;  %v509_v20 = vld [vmem:[#allocation7 + $0x20] sm:$0xff]  ;;  %v508_v21 = vld [vmem:[#allocation7 + $0x18] sm:$0xff] }
  0x65   :  { %830 = vmatpush3.msra.mxu1 %v194_v31  ;;  %796 = vmatprep.subr.mxu0 %v177_v32  ;;  %v507_v22 = vld [vmem:[#allocation7 + $0x10] sm:$0xff]  ;;  %v506_v23 = vld [vmem:[#allocation7 + $0x8] sm:$0xff]  ;;  %v505_v24 = vld [vmem:[#allocation7] sm:$0xff] }
  0x66   :  { %831 = vmatprep.subr.mxu1 %v209_v33  ;;  %797 = vmatpush3.msra.mxu0 %v161_v34  ;;  %v614_v25 = vld [vmem:[#allocation8 + $0x78] sm:$0xff]  ;;  %v613_v26 = vld [vmem:[#allocation8 + $0x70] sm:$0xff]  ;;  %v612_v27 = vld [vmem:[#allocation8 + $0x68] sm:$0xff] }
  0x67   :  { %832 = vmatpush3.msra.mxu1 %v193_v35  ;;  %798 = vmatprep.subr.mxu0 %v176_v36  ;;  %v611_v28 = vld [vmem:[#allocation8 + $0x60] sm:$0xff]  ;;  %v610_v29 = vld [vmem:[#allocation8 + $0x58] sm:$0xff]  ;;  %v609_v30 = vld [vmem:[#allocation8 + $0x50] sm:$0xff] }
  0x68   :  { %833 = vmatprep.subr.mxu1 %v208_v37  ;;  %799 = vmatpush3.msra.mxu0 %v160_v38  ;;  %v608_v31 = vld [vmem:[#allocation8 + $0x48] sm:$0xff]  ;;  %v607_v32 = vld [vmem:[#allocation8 + $0x40] sm:$0xff]  ;;  %v606_v33 = vld [vmem:[#allocation8 + $0x38] sm:$0xff] }
  0x69   :  { %834 = vmatpush3.msra.mxu1 %v192_v39  ;;  %800 = vmatprep.subr.mxu0 %v175_v40  ;;  %v605_v34 = vld [vmem:[#allocation8 + $0x30] sm:$0xff]  ;;  %v604_v35 = vld [vmem:[#allocation8 + $0x28] sm:$0xff]  ;;  %v603_v36 = vld [vmem:[#allocation8 + $0x20] sm:$0xff] }
  0x6a   :  { %835 = vmatprep.subr.mxu1 %v207_v41  ;;  %801 = vmatpush3.msra.mxu0 %v159_v42  ;;  %v602_v37 = vld [vmem:[#allocation8 + $0x18] sm:$0xff]  ;;  %v709_v42 = vld [vmem:[%s1191_s2] ss:$0 sm:$0xff] }
  0x6b   :  { %836 = vmatpush3.msra.mxu1 %v191_v43  ;;  %802 = vmatprep.subr.mxu0 %v174_v44 }
  0x6c   :  { %837 = vmatprep.subr.mxu1 %v206_v45  ;;  %803 = vmatpush3.msra.mxu0 %v158_v46 }
  0x6d   :  { %838 = vmatpush3.msra.mxu1 %v190_v47  ;;  %804 = vmatprep.subr.mxu0 %v173_v48 }
  0x6e   :  { %839 = vmatprep.subr.mxu1 %v205_v49  ;;  %805 = vmatpush3.msra.mxu0 %v157_v50 }
  0x6f   :  { %840 = vmatpush3.msra.mxu1 %v189_v51  ;;  %806 = vmatprep.subr.mxu0 %v172_v52 }
  0x70   :  { %841 = vmatprep.subr.mxu1 %v204_v53  ;;  %807 = vmatpush3.msra.mxu0 %v156_v54 }
  0x71   :  { %842 = vmatpush3.msra.mxu1 %v188_v55  ;;  %808 = vmatprep.subr.mxu0 %v171_v56  ;;  %v601_v56 = vld [vmem:[#allocation8 + $0x10] sm:$0xff] }
  0x72   :  { %843 = vmatprep.subr.mxu1 %v203_v57  ;;  %809 = vmatpush3.msra.mxu0 %v155_v58  ;;  %v600_v57 = vld [vmem:[#allocation8 + $0x8] sm:$0xff]  ;;  %v599_v58 = vld [vmem:[#allocation8] sm:$0xff] }
  0x73   :  { %844 = vmatpush3.msra.mxu1 %v187_v59  ;;  %810 = vmatprep.subr.mxu0 %v170_v60  ;;  %v710_v59 = vld [vmem:[%s1193_s4] ss:$0 sm:$0xff] }
  0x74   :  { %845 = vmatprep.subr.mxu1 %v202_v61  ;;  %811 = vmatpush3.msra.mxu0 %v154_v62 }
  0x75   :  { %846 = vmatpush3.msra.mxu1 %v186_v63  ;;  %812 = vmatprep.subr.mxu0 %v169_v0  ;;  %v711_v0 = vld [vmem:[%s1195_s6] ss:$0 sm:$0xff] }
  0x76   :  { %847 = vmatprep.subr.mxu1 %v201_v1  ;;  %813 = vmatpush3.msra.mxu0 %v153_v2 }
  0x77   :  { %427 = vmatprep.mubr.f32.mxu0 %v85_v3  ;;  %848 = vmatpush3.msra.mxu1 %v185_v4 }
  0x78   :  { %497 = vmatprep.mubr.f32.mxu1 %v87_v5  ;;  %428 = vmatmul.mubr.f32.vlgmr.msra.gmra.mxu0 %v84_v6 }
  0x79   :  { %498 = vmatmul.mubr.f32.vlgmr.msra.gmra.mxu1 %v86_v7  ;;  %886 = vmatprep.subr.mxu0 %v1079_v9 }
  0x7a   :  { %921 = vmatprep.subr.mxu1 %v1079_v9  ;;  %887 = vmatpush3.msra.mxu0 %v520_v8 }
  0x7b   :  { %888 = vmatprep.subr.mxu0 %v1079_v9  ;;  %918 = vmatprep.mubr.msk.f32.mxu0 %vm1080_vm0, %v1079_v9 }
  0x7c   :  { %889 = vmatpush3.msra.mxu0 %v519_v10  ;;  %953 = vmatprep.mubr.msk.f32.mxu1 %vm1080_vm0, %v1079_v9 }
  0x7d   :  { %890 = vmatprep.subr.mxu0 %v1079_v9  ;;  %922 = vmatpush3.msra.mxu1 %v614_v25 }
  0x7e   :  { %891 = vmatpush3.msra.mxu0 %v518_v11  ;;  %923 = vmatprep.subr.mxu1 %v1079_v9 }
  0x7f   :  { %892 = vmatprep.subr.mxu0 %v1079_v9  ;;  %924 = vmatpush3.msra.mxu1 %v613_v26 }
  0x80   :  { %893 = vmatpush3.msra.mxu0 %v517_v12  ;;  %925 = vmatprep.subr.mxu1 %v1079_v9 }
  0x81   :  { %894 = vmatprep.subr.mxu0 %v1079_v9  ;;  %926 = vmatpush3.msra.mxu1 %v612_v27 }
  0x82   :  { %895 = vmatpush3.msra.mxu0 %v516_v13  ;;  %927 = vmatprep.subr.mxu1 %v1079_v9 }
  0x83   :  { %896 = vmatprep.subr.mxu0 %v1079_v9  ;;  %928 = vmatpush3.msra.mxu1 %v611_v28 }
  0x84   :  { %897 = vmatpush3.msra.mxu0 %v515_v14  ;;  %929 = vmatprep.subr.mxu1 %v1079_v9 }
  0x85   :  { %898 = vmatprep.subr.mxu0 %v1079_v9  ;;  %930 = vmatpush3.msra.mxu1 %v610_v29 }
  0x86   :  { %899 = vmatpush3.msra.mxu0 %v514_v15  ;;  %931 = vmatprep.subr.mxu1 %v1079_v9 }
  0x87   :  { %900 = vmatprep.subr.mxu0 %v1079_v9  ;;  %932 = vmatpush3.msra.mxu1 %v609_v30 }
  0x88   :  { %901 = vmatpush3.msra.mxu0 %v513_v16  ;;  %933 = vmatprep.subr.mxu1 %v1079_v9 }
  0x89   :  { %902 = vmatprep.subr.mxu0 %v1079_v9  ;;  %934 = vmatpush3.msra.mxu1 %v608_v31 }
  0x8a   :  { %903 = vmatpush3.msra.mxu0 %v512_v17  ;;  %935 = vmatprep.subr.mxu1 %v1079_v9 }
  0x8b   :  { %904 = vmatprep.subr.mxu0 %v1079_v9  ;;  %936 = vmatpush3.msra.mxu1 %v607_v32 }
  0x8c   :  { %905 = vmatpush3.msra.mxu0 %v511_v18  ;;  %937 = vmatprep.subr.mxu1 %v1079_v9 }
  0x8d   :  { %906 = vmatprep.subr.mxu0 %v1079_v9  ;;  %938 = vmatpush3.msra.mxu1 %v606_v33 }
  0x8e   :  { %907 = vmatpush3.msra.mxu0 %v510_v19  ;;  %939 = vmatprep.subr.mxu1 %v1079_v9 }
  0x8f   :  { %908 = vmatprep.subr.mxu0 %v1079_v9  ;;  %940 = vmatpush3.msra.mxu1 %v605_v34 }
  0x90   :  { %909 = vmatpush3.msra.mxu0 %v509_v20  ;;  %941 = vmatprep.subr.mxu1 %v1079_v9 }
  0x91   :  { %910 = vmatprep.subr.mxu0 %v1079_v9  ;;  %942 = vmatpush3.msra.mxu1 %v604_v35 }
  0x92   :  { %911 = vmatpush3.msra.mxu0 %v508_v21  ;;  %943 = vmatprep.subr.mxu1 %v1079_v9 }
  0x93   :  { %912 = vmatprep.subr.mxu0 %v1079_v9  ;;  %944 = vmatpush3.msra.mxu1 %v603_v36 }
  0x94   :  { %913 = vmatpush3.msra.mxu0 %v507_v22  ;;  %945 = vmatprep.subr.mxu1 %v1079_v9 }
  0x95   :  { %914 = vmatprep.subr.mxu0 %v1079_v9  ;;  %946 = vmatpush3.msra.mxu1 %v602_v37 }
  0x96   :  { %915 = vmatpush3.msra.mxu0 %v506_v23  ;;  %947 = vmatprep.subr.mxu1 %v1079_v9 }
  0x97   :  { %916 = vmatprep.subr.mxu0 %v1079_v9  ;;  %948 = vmatpush3.msra.mxu1 %v601_v56 }
  0x98   :  { %917 = vmatpush3.msra.mxu0 %v505_v24  ;;  %949 = vmatprep.subr.mxu1 %v1079_v9 }
  0x99   :  { %950 = vmatpush3.msra.mxu1 %v600_v57 }
  0x9a   :  { %951 = vmatprep.subr.mxu1 %v1079_v9 }
  0x9b   :  { %952 = vmatpush3.msra.mxu1 %v599_v58 }
 0x116   :  { %v744_v38 = vpop.f32.mrf.mxu0 }
 0x118   :  { %v779_v39 = vpop.f32.mrf.mxu1  ;;  %v745_v40 = vpop.f32.mrf.mxu0 }
 0x119   :  { %v746_v41 = vadd.f32 %v745_v40, %v744_v38 }
 0x11a   :  { %v780_v43 = vpop.f32.mrf.mxu1 }
 0x11b   :  { %v290_v44 = vadd.f32 %v746_v41, %v709_v42  ;;  %v781_v45 = vadd.f32 %v780_v43, %v779_v39 }
 0x11d   :  { %v360_v50 = vadd.f32 %v781_v45, %v290_v44 }
 0x138   :  { %v814_v46 = vpop.f32.mrf.mxu0 }
 0x139   :  { %v849_v47 = vpop.f32.mrf.mxu1 }
 0x13a   :  { %v815_v48 = vpop.f32.mrf.mxu0 }
 0x13b   :  { %v850_v49 = vpop.f32.mrf.mxu1  ;;  %v816_v51 = vadd.f32 %v815_v48, %v814_v46 }
 0x13c   :  { %v851_v53 = vadd.f32 %v850_v49, %v849_v47 }
 0x13d   :  { %v430_v52 = vadd.f32 %v816_v51, %v360_v50 }
 0x13f   :  { %v500_v54 = vadd.f32 %v851_v53, %v430_v52 }
 0x141   :  { %v503_v55 = vmax.f32 %v500_v54, 0.0 }
 0x143   :  { %919 = vmatmul.mubr.f32.vlgmr.msra.gmra.mxu0 %v503_v55 }
 0x203   :  { %v593_v60 = vpop.f32.mrf.mxu0 }
 0x204   :  { %v594_v61 = vadd.f32 %v710_v59, %v593_v60 }
 0x205   :  { %v920_v62 = vpop.f32.mrf.mxu0 }
 0x206   :  { %v597_v63 = vmax.f32 %v594_v61, 0.0 }
 0x208   :  { %954 = vmatmul.mubr.f32.vlgmr.msra.gmra.mxu1 %v597_v63 }
 0x2c8   :  { %v687_v1 = vpop.f32.mrf.mxu1 }
 0x2c9   :  { %v688_v2 = vadd.f32 %v711_v0, %v687_v1 }
 0x2ca   :  { %v955_v3 = vpop.f32.mrf.mxu1 }
 0x2cb   :  { %691 = vst [vmem:[#allocation10] sm:$0xff] %v688_v2 }
 0x2cc   :  { %1056 = shalt.err (!%p1053_p10)
}
 0x2cd   :  { %701 = dma.vmem_to_hbm [thread:$0]  %s699_s25, 128, %s1196_s7, [#allocation4]  }
 0x2ce   :  { %1071 = dma.done.wait [#allocation4], 128  }
 0x2cf   :  { %1072 = vsyncadd [#allocation4], 4294967168 }
 0x2d0   :  { %705 = vsyncpa [#allocation3], 1 }
 0x2d1   :  { %706 = vsyncpa [#allocation6], 1 }
 0x2d2   :  { %707 = vsyncpa [#allocation9], 1 }
 0x2d3   :  { %708 = vsyncpa [#allocation4], 1 }

// kernel: tpu_custom_call.1
= control target key start
LH: loop header
LB: loop body
LE: loop exit
PB: predicated region body
PF: predicated region fallthrough
CT: control target
= control target key end

     0   :  { %12 = vsyncpa [#allocation3], 0  ;;  %s1189_s0 = inlined_call_operand.hbm [shape: f32[8,1024], index: 0, kind: input, shape index: {}]   ;;  %s1190_s1 = inlined_call_operand.hbm [shape: f32[1024,128], index: 1, kind: input, shape index: {}]   ;;  %s1191_s2 = inlined_call_operand.vmem [shape: f32[1,128], index: 2, kind: input, shape index: {}]   ;;  %s1192_s3 = inlined_call_operand.hbm [shape: f32[128,128], index: 3, kind: input, shape index: {}]   ;;  %s1193_s4 = inlined_call_operand.vmem [shape: f32[1,128], index: 4, kind: input, shape index: {}]   ;;  %s1194_s5 = inlined_call_operand.hbm [shape: f32[128,128], index: 5, kind: input, shape index: {}]   ;;  %s1195_s6 = inlined_call_operand.vmem [shape: f32[1,128], index: 6, kind: input, shape index: {}]   ;;  %s1196_s7 = inlined_call_operand.hbm [shape: f32[8,128], index: 7, kind: output, shape index: {}]  }
   0x1   :  { %13 = vsyncpa [#allocation6], 0 }
   0x2   :  { %14 = vsyncpa [#allocation9], 0 }
   0x3   :  { %15 = vsyncpa [#allocation4], 0  ;;  %s1073_s24 = smov [#allocation5]  }
   0x4   :  { %s31_s25 = sshll.u32 %s1073_s24, 4  ;;  %s32_s25 = int_to_ptr.vmem [resolvable:$true] %s31_s25 }
   0x5   :  { %s973_s26 = scalar_lea.vmem %s32_s25, 16384  ;;  %p978_p1 = scmp.lt.s32.totalorder %s32_s25, %s32_s25 }
   0x6   :  { %p974_p0 = scmp.ne.s32.totalorder %s32_s25, %s973_s26  ;;  %p979_p2 = scmp.lt.s32.totalorder %s973_s26, %s973_s26 }
   0x8   :  { %p980_p3 = por %p979_p2, %p978_p1 }
   0xa   :  { %p981_p4 = pnand %p980_p3, %p974_p0 }
   0xc   :  { %984 = shalt.err (!%p981_p4)
}
   0xd   :  { %s1074_s27 = smov 128   ;;  %s1075_s28 = smov 8  }
   0xe   :  { %37 = dma.hbm_to_vmem [thread:$0]  %s1190_s1, 16384, %s32_s25, [#allocation6], %s1074_s27, %s1074_s27, %s1075_s28  }
   0xf   :  { %s1076_s8 = smov [#allocation2]   ;;  %s1077_s10 = smov [#allocation7]  }
  0x10   :  { %s22_s9 = sshll.u32 %s1076_s8, 4  ;;  %s45_s11 = sshll.u32 %s1077_s10, 4  ;;  %s23_s9 = int_to_ptr.vmem [resolvable:$true] %s22_s9  ;;  %s46_s11 = int_to_ptr.vmem [resolvable:$true] %s45_s11 }
  0x11   :  { %s993_s12 = scalar_lea.vmem %s23_s9, 1024  ;;  %p998_p6 = scmp.lt.s32.totalorder %s23_s9, %s23_s9 }
  0x12   :  { %p994_p5 = scmp.ne.s32.totalorder %s23_s9, %s993_s12  ;;  %p999_p7 = scmp.lt.s32.totalorder %s993_s12, %s993_s12 }
  0x14   :  { %p1000_p8 = por %p999_p7, %p998_p6 }
  0x16   :  { %p1001_p9 = pnand %p1000_p8, %p994_p5 }
  0x18   :  { %1004 = shalt.err (!%p1001_p9)
}
  0x19   :  { %25 = dma.hbm_to_vmem [thread:$0]  %s1189_s0, 1024, %s23_s9, [#allocation3]  }
  0x1a   :  { %s1013_s15 = scalar_lea.vmem %s46_s11, 2048  ;;  %p1018_p11 = scmp.lt.s32.totalorder %s46_s11, %s46_s11 }
  0x1b   :  { %p1014_p10 = scmp.ne.s32.totalorder %s46_s11, %s1013_s15  ;;  %p1019_p12 = scmp.lt.s32.totalorder %s1013_s15, %s1013_s15 }
  0x1d   :  { %p1020_p13 = por %p1019_p12, %p1018_p11 }
  0x1f   :  { %p1021_p0 = pnand %p1020_p13, %p1014_p10 }
  0x21   :  { %1024 = shalt.err (!%p1021_p0)
}
  0x22   :  { %51 = dma.hbm_to_vmem [thread:$0]  %s1192_s3, 2048, %s46_s11, [#allocation6], %s1074_s27, %s1074_s27, %s1075_s28  }
  0x23   :  { %s1078_s17 = smov [#allocation8]  }
  0x24   :  { %s59_s18 = sshll.u32 %s1078_s17, 4  ;;  %s60_s18 = int_to_ptr.vmem [resolvable:$true] %s59_s18 }
  0x25   :  { %s1033_s19 = scalar_lea.vmem %s60_s18, 2048  ;;  %p1038_p2 = scmp.lt.s32.totalorder %s60_s18, %s60_s18 }
  0x26   :  { %p1034_p1 = scmp.ne.s32.totalorder %s60_s18, %s1033_s19  ;;  %p1039_p3 = scmp.lt.s32.totalorder %s1033_s19, %s1033_s19 }
  0x28   :  { %p1040_p4 = por %p1039_p3, %p1038_p2 }
  0x2a   :  { %p1041_p5 = pnand %p1040_p4, %p1034_p1 }
  0x2c   :  { %1044 = shalt.err (!%p1041_p5)
}
  0x2d   :  { %65 = dma.hbm_to_vmem [thread:$0]  %s1194_s5, 2048, %s60_s18, [#allocation9], %s1074_s27, %s1074_s27, %s1075_s28  }
  0x2e   :  { %1065 = dma.done.wait [#allocation3], 1024  }
  0x2f   :  { %1066 = vsyncadd [#allocation3], 4294966272 }
  0x30   :  { %1067 = dma.done.wait [#allocation6], 18432  }
  0x31   :  { %1068 = vsyncadd [#allocation6], 4294948864 }
  0x32   :  { %1069 = dma.done.wait [#allocation9], 2048  }
  0x33   :  { %1070 = vsyncadd [#allocation9], 4294965248  ;;  %v120_v0 = vld [vmem:[#allocation5 + $0xf8] sm:$0xff]  ;;  %v119_v4 = vld [vmem:[#allocation5 + $0xf0] sm:$0xff]  ;;  %vm1080_vm0 = vmmov 0   ;;  %s1081_s24 = smov [#allocation10]  }
  0x34   :  { %v152_v1 = vld [vmem:[#allocation5 + $0x1f8] sm:$0xff]  ;;  %712 = vmatprep.subr.mxu0 %v120_v0  ;;  %v151_v5 = vld [vmem:[#allocation5 + $0x1f0] sm:$0xff]  ;;  %v118_v8 = vld [vmem:[#allocation5 + $0xe8] sm:$0xff]  ;;  %s698_s25 = sshll.u32 %s1081_s24, 4  ;;  %s699_s25 = int_to_ptr.vmem [resolvable:$true] %s698_s25 }
  0x35   :  { %v104_v2 = vld [vmem:[#allocation5 + $0x78] sm:$0xff]  ;;  %747 = vmatprep.subr.mxu1 %v152_v1  ;;  %v103_v6 = vld [vmem:[#allocation5 + $0x70] sm:$0xff]  ;;  %v150_v9 = vld [vmem:[#allocation5 + $0x1e8] sm:$0xff]  ;;  %s1045_s26 = scalar_lea.vmem %s699_s25, 128  ;;  %p1050_p7 = scmp.lt.s32.totalorder %s699_s25, %s699_s25 }
  0x36   :  { %v136_v3 = vld [vmem:[#allocation5 + $0x178] sm:$0xff]  ;;  %713 = vmatpush3.msra.mxu0 %v104_v2  ;;  %v135_v7 = vld [vmem:[#allocation5 + $0x170] sm:$0xff]  ;;  %v102_v10 = vld [vmem:[#allocation5 + $0x68] sm:$0xff]  ;;  %p1046_p6 = scmp.ne.s32.totalorder %s699_s25, %s1045_s26  ;;  %p1051_p8 = scmp.lt.s32.totalorder %s1045_s26, %s1045_s26 }
  0x37   :  { %748 = vmatpush3.msra.mxu1 %v136_v3  ;;  %714 = vmatprep.subr.mxu0 %v119_v4  ;;  %v134_v11 = vld [vmem:[#allocation5 + $0x168] sm:$0xff]  ;;  %v117_v12 = vld [vmem:[#allocation5 + $0xe0] sm:$0xff]  ;;  %v116_v16 = vld [vmem:[#allocation5 + $0xd8] sm:$0xff] }
  0x38   :  { %749 = vmatprep.subr.mxu1 %v151_v5  ;;  %715 = vmatpush3.msra.mxu0 %v103_v6  ;;  %v149_v13 = vld [vmem:[#allocation5 + $0x1e0] sm:$0xff]  ;;  %v148_v17 = vld [vmem:[#allocation5 + $0x1d8] sm:$0xff]  ;;  %v115_v20 = vld [vmem:[#allocation5 + $0xd0] sm:$0xff]  ;;  %p1052_p9 = por %p1051_p8, %p1050_p7 }
  0x39   :  { %750 = vmatpush3.msra.mxu1 %v135_v7  ;;  %716 = vmatprep.subr.mxu0 %v118_v8  ;;  %v101_v14 = vld [vmem:[#allocation5 + $0x60] sm:$0xff]  ;;  %v100_v18 = vld [vmem:[#allocation5 + $0x58] sm:$0xff]  ;;  %v147_v21 = vld [vmem:[#allocation5 + $0x1d0] sm:$0xff] }
  0x3a   :  { %751 = vmatprep.subr.mxu1 %v150_v9  ;;  %v133_v15 = vld [vmem:[#allocation5 + $0x160] sm:$0xff]  ;;  %717 = vmatpush3.msra.mxu0 %v102_v10  ;;  %v132_v19 = vld [vmem:[#allocation5 + $0x158] sm:$0xff]  ;;  %v99_v22 = vld [vmem:[#allocation5 + $0x50] sm:$0xff]  ;;  %p1053_p10 = pnand %p1052_p9, %p1046_p6 }
  0x3b   :  { %752 = vmatpush3.msra.mxu1 %v134_v11  ;;  %718 = vmatprep.subr.mxu0 %v117_v12  ;;  %v131_v23 = vld [vmem:[#allocation5 + $0x150] sm:$0xff]  ;;  %v114_v24 = vld [vmem:[#allocation5 + $0xc8] sm:$0xff]  ;;  %v113_v28 = vld [vmem:[#allocation5 + $0xc0] sm:$0xff] }
  0x3c   :  { %753 = vmatprep.subr.mxu1 %v149_v13  ;;  %719 = vmatpush3.msra.mxu0 %v101_v14  ;;  %v146_v25 = vld [vmem:[#allocation5 + $0x1c8] sm:$0xff]  ;;  %v145_v29 = vld [vmem:[#allocation5 + $0x1c0] sm:$0xff]  ;;  %v112_v32 = vld [vmem:[#allocation5 + $0xb8] sm:$0xff] }
  0x3d   :  { %754 = vmatpush3.msra.mxu1 %v133_v15  ;;  %720 = vmatprep.subr.mxu0 %v116_v16  ;;  %v98_v26 = vld [vmem:[#allocation5 + $0x48] sm:$0xff]  ;;  %v97_v30 = vld [vmem:[#allocation5 + $0x40] sm:$0xff]  ;;  %v144_v33 = vld [vmem:[#allocation5 + $0x1b8] sm:$0xff] }
  0x3e   :  { %755 = vmatprep.subr.mxu1 %v148_v17  ;;  %721 = vmatpush3.msra.mxu0 %v100_v18  ;;  %v130_v27 = vld [vmem:[#allocation5 + $0x148] sm:$0xff]  ;;  %v129_v31 = vld [vmem:[#allocation5 + $0x140] sm:$0xff]  ;;  %v96_v34 = vld [vmem:[#allocation5 + $0x38] sm:$0xff] }
  0x3f   :  { %756 = vmatpush3.msra.mxu1 %v132_v19  ;;  %722 = vmatprep.subr.mxu0 %v115_v20  ;;  %v128_v35 = vld [vmem:[#allocation5 + $0x138] sm:$0xff]  ;;  %v111_v36 = vld [vmem:[#allocation5 + $0xb0] sm:$0xff]  ;;  %v110_v40 = vld [vmem:[#allocation5 + $0xa8] sm:$0xff] }
  0x40   :  { %757 = vmatprep.subr.mxu1 %v147_v21  ;;  %723 = vmatpush3.msra.mxu0 %v99_v22  ;;  %v143_v37 = vld [vmem:[#allocation5 + $0x1b0] sm:$0xff]  ;;  %v142_v41 = vld [vmem:[#allocation5 + $0x1a8] sm:$0xff]  ;;  %v109_v44 = vld [vmem:[#allocation5 + $0xa0] sm:$0xff] }
  0x41   :  { %758 = vmatpush3.msra.mxu1 %v131_v23  ;;  %724 = vmatprep.subr.mxu0 %v114_v24  ;;  %v95_v38 = vld [vmem:[#allocation5 + $0x30] sm:$0xff]  ;;  %v94_v42 = vld [vmem:[#allocation5 + $0x28] sm:$0xff]  ;;  %v141_v45 = vld [vmem:[#allocation5 + $0x1a0] sm:$0xff] }
  0x42   :  { %759 = vmatprep.subr.mxu1 %v146_v25  ;;  %725 = vmatpush3.msra.mxu0 %v98_v26  ;;  %v127_v39 = vld [vmem:[#allocation5 + $0x130] sm:$0xff]  ;;  %v126_v43 = vld [vmem:[#allocation5 + $0x128] sm:$0xff]  ;;  %v93_v46 = vld [vmem:[#allocation5 + $0x20] sm:$0xff] }
  0x43   :  { %760 = vmatpush3.msra.mxu1 %v130_v27  ;;  %726 = vmatprep.subr.mxu0 %v113_v28  ;;  %v125_v47 = vld [vmem:[#allocation5 + $0x120] sm:$0xff]  ;;  %v108_v48 = vld [vmem:[#allocation5 + $0x98] sm:$0xff]  ;;  %v107_v52 = vld [vmem:[#allocation5 + $0x90] sm:$0xff] }
  0x44   :  { %761 = vmatprep.subr.mxu1 %v145_v29  ;;  %727 = vmatpush3.msra.mxu0 %v97_v30  ;;  %v140_v49 = vld [vmem:[#allocation5 + $0x198] sm:$0xff]  ;;  %v139_v53 = vld [vmem:[#allocation5 + $0x190] sm:$0xff]  ;;  %v106_v56 = vld [vmem:[#allocation5 + $0x88] sm:$0xff] }
  0x45   :  { %762 = vmatpush3.msra.mxu1 %v129_v31  ;;  %728 = vmatprep.subr.mxu0 %v112_v32  ;;  %v92_v50 = vld [vmem:[#allocation5 + $0x18] sm:$0xff]  ;;  %v91_v54 = vld [vmem:[#allocation5 + $0x10] sm:$0xff]  ;;  %v138_v57 = vld [vmem:[#allocation5 + $0x188] sm:$0xff] }
  0x46   :  { %763 = vmatprep.subr.mxu1 %v144_v33  ;;  %729 = vmatpush3.msra.mxu0 %v96_v34  ;;  %v124_v51 = vld [vmem:[#allocation5 + $0x118] sm:$0xff]  ;;  %v123_v55 = vld [vmem:[#allocation5 + $0x110] sm:$0xff]  ;;  %v90_v58 = vld [vmem:[#allocation5 + $0x8] sm:$0xff] }
  0x47   :  { %764 = vmatpush3.msra.mxu1 %v128_v35  ;;  %730 = vmatprep.subr.mxu0 %v111_v36  ;;  %v122_v59 = vld [vmem:[#allocation5 + $0x108] sm:$0xff]  ;;  %v105_v60 = vld [vmem:[#allocation5 + $0x80] sm:$0xff]  ;;  %v83_v2 = vld [vmem:[#allocation2 + $0x18] sm:$0xff] }
  0x48   :  { %765 = vmatprep.subr.mxu1 %v143_v37  ;;  %731 = vmatpush3.msra.mxu0 %v95_v38  ;;  %v137_v61 = vld [vmem:[#allocation5 + $0x180] sm:$0xff]  ;;  %v81_v63 = vld [vmem:[#allocation2 + $0x8] sm:$0xff]  ;;  %v184_v3 = vld [vmem:[#allocation5 + $0x2f8] sm:$0xff] }
  0x49   :  { %766 = vmatpush3.msra.mxu1 %v127_v39  ;;  %732 = vmatprep.subr.mxu0 %v110_v40  ;;  %v89_v62 = vld [vmem:[#allocation5] sm:$0xff]  ;;  %v216_v4 = vld [vmem:[#allocation5 + $0x3f8] sm:$0xff]  ;;  %v82_v5 = vld [vmem:[#allocation2 + $0x10] sm:$0xff] }
  0x4a   :  { %767 = vmatprep.subr.mxu1 %v142_v41  ;;  %733 = vmatpush3.msra.mxu0 %v94_v42  ;;  %v121_v0 = vld [vmem:[#allocation5 + $0x100] sm:$0xff]  ;;  %v168_v6 = vld [vmem:[#allocation5 + $0x278] sm:$0xff]  ;;  %v183_v8 = vld [vmem:[#allocation5 + $0x2f0] sm:$0xff] }
  0x4b   :  { %768 = vmatpush3.msra.mxu1 %v126_v43  ;;  %734 = vmatprep.subr.mxu0 %v109_v44  ;;  %v80_v1 = vld [vmem:[#allocation2] sm:$0xff]  ;;  %v200_v7 = vld [vmem:[#allocation5 + $0x378] sm:$0xff]  ;;  %v215_v9 = vld [vmem:[#allocation5 + $0x3f0] sm:$0xff] }
  0x4c   :  { %769 = vmatprep.subr.mxu1 %v141_v45  ;;  %735 = vmatpush3.msra.mxu0 %v93_v46  ;;  %v167_v10 = vld [vmem:[#allocation5 + $0x270] sm:$0xff]  ;;  %v182_v12 = vld [vmem:[#allocation5 + $0x2e8] sm:$0xff]  ;;  %v181_v16 = vld [vmem:[#allocation5 + $0x2e0] sm:$0xff] }
  0x4d   :  { %770 = vmatpush3.msra.mxu1 %v125_v47  ;;  %736 = vmatprep.subr.mxu0 %v108_v48  ;;  %v199_v11 = vld [vmem:[#allocation5 + $0x370] sm:$0xff]  ;;  %v214_v13 = vld [vmem:[#allocation5 + $0x3e8] sm:$0xff]  ;;  %v213_v17 = vld [vmem:[#allocation5 + $0x3e0] sm:$0xff] }
  0x4e   :  { %771 = vmatprep.subr.mxu1 %v140_v49  ;;  %737 = vmatpush3.msra.mxu0 %v92_v50  ;;  %v166_v14 = vld [vmem:[#allocation5 + $0x268] sm:$0xff]  ;;  %v165_v18 = vld [vmem:[#allocation5 + $0x260] sm:$0xff]  ;;  %v180_v20 = vld [vmem:[#allocation5 + $0x2d8] sm:$0xff] }
  0x4f   :  { %772 = vmatpush3.msra.mxu1 %v124_v51  ;;  %738 = vmatprep.subr.mxu0 %v107_v52  ;;  %v198_v15 = vld [vmem:[#allocation5 + $0x368] sm:$0xff]  ;;  %v197_v19 = vld [vmem:[#allocation5 + $0x360] sm:$0xff]  ;;  %v212_v21 = vld [vmem:[#allocation5 + $0x3d8] sm:$0xff] }
  0x50   :  { %773 = vmatprep.subr.mxu1 %v139_v53  ;;  %739 = vmatpush3.msra.mxu0 %v91_v54  ;;  %v164_v22 = vld [vmem:[#allocation5 + $0x258] sm:$0xff]  ;;  %v179_v24 = vld [vmem:[#allocation5 + $0x2d0] sm:$0xff]  ;;  %v178_v28 = vld [vmem:[#allocation5 + $0x2c8] sm:$0xff] }
  0x51   :  { %774 = vmatpush3.msra.mxu1 %v123_v55  ;;  %740 = vmatprep.subr.mxu0 %v106_v56  ;;  %v196_v23 = vld [vmem:[#allocation5 + $0x358] sm:$0xff]  ;;  %v211_v25 = vld [vmem:[#allocation5 + $0x3d0] sm:$0xff]  ;;  %v210_v29 = vld [vmem:[#allocation5 + $0x3c8] sm:$0xff] }
  0x52   :  { %775 = vmatprep.subr.mxu1 %v138_v57  ;;  %741 = vmatpush3.msra.mxu0 %v90_v58  ;;  %v163_v26 = vld [vmem:[#allocation5 + $0x250] sm:$0xff]  ;;  %v162_v30 = vld [vmem:[#allocation5 + $0x248] sm:$0xff]  ;;  %v177_v32 = vld [vmem:[#allocation5 + $0x2c0] sm:$0xff] }
  0x53   :  { %776 = vmatpush3.msra.mxu1 %v122_v59  ;;  %742 = vmatprep.subr.mxu0 %v105_v60  ;;  %v195_v27 = vld [vmem:[#allocation5 + $0x350] sm:$0xff]  ;;  %v194_v31 = vld [vmem:[#allocation5 + $0x348] sm:$0xff]  ;;  %v209_v33 = vld [vmem:[#allocation5 + $0x3c0] sm:$0xff] }
  0x54   :  { %777 = vmatprep.subr.mxu1 %v137_v61  ;;  %743 = vmatpush3.msra.mxu0 %v89_v62  ;;  %v161_v34 = vld [vmem:[#allocation5 + $0x240] sm:$0xff]  ;;  %v176_v36 = vld [vmem:[#allocation5 + $0x2b8] sm:$0xff]  ;;  %v175_v40 = vld [vmem:[#allocation5 + $0x2b0] sm:$0xff] }
  0x55   :  { %287 = vmatprep.mubr.f32.mxu0 %v81_v63  ;;  %778 = vmatpush3.msra.mxu1 %v121_v0  ;;  %v193_v35 = vld [vmem:[#allocation5 + $0x340] sm:$0xff]  ;;  %v208_v37 = vld [vmem:[#allocation5 + $0x3b8] sm:$0xff]  ;;  %v207_v41 = vld [vmem:[#allocation5 + $0x3b0] sm:$0xff] }
  0x56   :  { %288 = vmatmul.mubr.f32.vlgmr.msra.gmra.mxu0 %v80_v1  ;;  %357 = vmatprep.mubr.f32.mxu1 %v83_v2  ;;  %v160_v38 = vld [vmem:[#allocation5 + $0x238] sm:$0xff]  ;;  %v159_v42 = vld [vmem:[#allocation5 + $0x230] sm:$0xff]  ;;  %v174_v44 = vld [vmem:[#allocation5 + $0x2a8] sm:$0xff] }
  0x57   :  { %782 = vmatprep.subr.mxu0 %v184_v3  ;;  %817 = vmatprep.subr.mxu1 %v216_v4  ;;  %v192_v39 = vld [vmem:[#allocation5 + $0x338] sm:$0xff]  ;;  %v191_v43 = vld [vmem:[#allocation5 + $0x330] sm:$0xff]  ;;  %v206_v45 = vld [vmem:[#allocation5 + $0x3a8] sm:$0xff] }
  0x58   :  { %358 = vmatmul.mubr.f32.vlgmr.msra.gmra.mxu1 %v82_v5  ;;  %783 = vmatpush3.msra.mxu0 %v168_v6  ;;  %v158_v46 = vld [vmem:[#allocation5 + $0x228] sm:$0xff]  ;;  %v173_v48 = vld [vmem:[#allocation5 + $0x2a0] sm:$0xff]  ;;  %v172_v52 = vld [vmem:[#allocation5 + $0x298] sm:$0xff] }
  0x59   :  { %818 = vmatpush3.msra.mxu1 %v200_v7  ;;  %784 = vmatprep.subr.mxu0 %v183_v8  ;;  %v190_v47 = vld [vmem:[#allocation5 + $0x328] sm:$0xff]  ;;  %v205_v49 = vld [vmem:[#allocation5 + $0x3a0] sm:$0xff]  ;;  %v204_v53 = vld [vmem:[#allocation5 + $0x398] sm:$0xff] }
  0x5a   :  { %819 = vmatprep.subr.mxu1 %v215_v9  ;;  %785 = vmatpush3.msra.mxu0 %v167_v10  ;;  %v157_v50 = vld [vmem:[#allocation5 + $0x220] sm:$0xff]  ;;  %v156_v54 = vld [vmem:[#allocation5 + $0x218] sm:$0xff]  ;;  %v171_v56 = vld [vmem:[#allocation5 + $0x290] sm:$0xff]  ;;  %v1079_v9 = vmov 0.0  }
  0x5b   :  { %820 = vmatpush3.msra.mxu1 %v199_v11  ;;  %786 = vmatprep.subr.mxu0 %v182_v12  ;;  %v189_v51 = vld [vmem:[#allocation5 + $0x320] sm:$0xff]  ;;  %v188_v55 = vld [vmem:[#allocation5 + $0x318] sm:$0xff]  ;;  %v203_v57 = vld [vmem:[#allocation5 + $0x390] sm:$0xff] }
  0x5c   :  { %821 = vmatprep.subr.mxu1 %v214_v13  ;;  %787 = vmatpush3.msra.mxu0 %v166_v14  ;;  %v155_v58 = vld [vmem:[#allocation5 + $0x210] sm:$0xff]  ;;  %v170_v60 = vld [vmem:[#allocation5 + $0x288] sm:$0xff]  ;;  %v169_v0 = vld [vmem:[#allocation5 + $0x280] sm:$0xff] }
  0x5d   :  { %822 = vmatpush3.msra.mxu1 %v198_v15  ;;  %788 = vmatprep.subr.mxu0 %v181_v16  ;;  %v187_v59 = vld [vmem:[#allocation5 + $0x310] sm:$0xff]  ;;  %v202_v61 = vld [vmem:[#allocation5 + $0x388] sm:$0xff]  ;;  %v201_v1 = vld [vmem:[#allocation5 + $0x380] sm:$0xff] }
  0x5e   :  { %823 = vmatprep.subr.mxu1 %v213_v17  ;;  %789 = vmatpush3.msra.mxu0 %v165_v18  ;;  %v154_v62 = vld [vmem:[#allocation5 + $0x208] sm:$0xff]  ;;  %v153_v2 = vld [vmem:[#allocation5 + $0x200] sm:$0xff]  ;;  %v87_v5 = vld [vmem:[#allocation2 + $0x38] sm:$0xff] }
  0x5f   :  { %824 = vmatpush3.msra.mxu1 %v197_v19  ;;  %790 = vmatprep.subr.mxu0 %v180_v20  ;;  %v186_v63 = vld [vmem:[#allocation5 + $0x308] sm:$0xff]  ;;  %v185_v4 = vld [vmem:[#allocation5 + $0x300] sm:$0xff]  ;;  %v86_v7 = vld [vmem:[#allocation2 + $0x30] sm:$0xff] }
  0x60   :  { %825 = vmatprep.subr.mxu1 %v212_v21  ;;  %791 = vmatpush3.msra.mxu0 %v164_v22  ;;  %v85_v3 = vld [vmem:[#allocation2 + $0x28] sm:$0xff]  ;;  %v84_v6 = vld [vmem:[#allocation2 + $0x20] sm:$0xff]  ;;  %v520_v8 = vld [vmem:[#allocation7 + $0x78] sm:$0xff] }
  0x61   :  { %826 = vmatpush3.msra.mxu1 %v196_v23  ;;  %792 = vmatprep.subr.mxu0 %v179_v24  ;;  %v519_v10 = vld [vmem:[#allocation7 + $0x70] sm:$0xff]  ;;  %v518_v11 = vld [vmem:[#allocation7 + $0x68] sm:$0xff]  ;;  %v517_v12 = vld [vmem:[#allocation7 + $0x60] sm:$0xff] }
  0x62   :  { %827 = vmatprep.subr.mxu1 %v211_v25  ;;  %793 = vmatpush3.msra.mxu0 %v163_v26  ;;  %v516_v13 = vld [vmem:[#allocation7 + $0x58] sm:$0xff]  ;;  %v515_v14 = vld [vmem:[#allocation7 + $0x50] sm:$0xff]  ;;  %v514_v15 = vld [vmem:[#allocation7 + $0x48] sm:$0xff] }
  0x63   :  { %828 = vmatpush3.msra.mxu1 %v195_v27  ;;  %794 = vmatprep.subr.mxu0 %v178_v28  ;;  %v513_v16 = vld [vmem:[#allocation7 + $0x40] sm:$0xff]  ;;  %v512_v17 = vld [vmem:[#allocation7 + $0x38] sm:$0xff]  ;;  %v511_v18 = vld [vmem:[#allocation7 + $0x30] sm:$0xff] }
  0x64   :  { %829 = vmatprep.subr.mxu1 %v210_v29  ;;  %795 = vmatpush3.msra.mxu0 %v162_v30  ;;  %v510_v19 = vld [vmem:[#allocation7 + $0x28] sm:$0xff]  ;;  %v509_v20 = vld [vmem:[#allocation7 + $0x20] sm:$0xff]  ;;  %v508_v21 = vld [vmem:[#allocation7 + $0x18] sm:$0xff] }
  0x65   :  { %830 = vmatpush3.msra.mxu1 %v194_v31  ;;  %796 = vmatprep.subr.mxu0 %v177_v32  ;;  %v507_v22 = vld [vmem:[#allocation7 + $0x10] sm:$0xff]  ;;  %v506_v23 = vld [vmem:[#allocation7 + $0x8] sm:$0xff]  ;;  %v505_v24 = vld [vmem:[#allocation7] sm:$0xff] }
  0x66   :  { %831 = vmatprep.subr.mxu1 %v209_v33  ;;  %797 = vmatpush3.msra.mxu0 %v161_v34  ;;  %v614_v25 = vld [vmem:[#allocation8 + $0x78] sm:$0xff]  ;;  %v613_v26 = vld [vmem:[#allocation8 + $0x70] sm:$0xff]  ;;  %v612_v27 = vld [vmem:[#allocation8 + $0x68] sm:$0xff] }
  0x67   :  { %832 = vmatpush3.msra.mxu1 %v193_v35  ;;  %798 = vmatprep.subr.mxu0 %v176_v36  ;;  %v611_v28 = vld [vmem:[#allocation8 + $0x60] sm:$0xff]  ;;  %v610_v29 = vld [vmem:[#allocation8 + $0x58] sm:$0xff]  ;;  %v609_v30 = vld [vmem:[#allocation8 + $0x50] sm:$0xff] }
  0x68   :  { %833 = vmatprep.subr.mxu1 %v208_v37  ;;  %799 = vmatpush3.msra.mxu0 %v160_v38  ;;  %v608_v31 = vld [vmem:[#allocation8 + $0x48] sm:$0xff]  ;;  %v607_v32 = vld [vmem:[#allocation8 + $0x40] sm:$0xff]  ;;  %v606_v33 = vld [vmem:[#allocation8 + $0x38] sm:$0xff] }
  0x69   :  { %834 = vmatpush3.msra.mxu1 %v192_v39  ;;  %800 = vmatprep.subr.mxu0 %v175_v40  ;;  %v605_v34 = vld [vmem:[#allocation8 + $0x30] sm:$0xff]  ;;  %v604_v35 = vld [vmem:[#allocation8 + $0x28] sm:$0xff]  ;;  %v603_v36 = vld [vmem:[#allocation8 + $0x20] sm:$0xff] }
  0x6a   :  { %835 = vmatprep.subr.mxu1 %v207_v41  ;;  %801 = vmatpush3.msra.mxu0 %v159_v42  ;;  %v602_v37 = vld [vmem:[#allocation8 + $0x18] sm:$0xff]  ;;  %v709_v42 = vld [vmem:[%s1191_s2] ss:$0 sm:$0xff] }
  0x6b   :  { %836 = vmatpush3.msra.mxu1 %v191_v43  ;;  %802 = vmatprep.subr.mxu0 %v174_v44 }
  0x6c   :  { %837 = vmatprep.subr.mxu1 %v206_v45  ;;  %803 = vmatpush3.msra.mxu0 %v158_v46 }
  0x6d   :  { %838 = vmatpush3.msra.mxu1 %v190_v47  ;;  %804 = vmatprep.subr.mxu0 %v173_v48 }
  0x6e   :  { %839 = vmatprep.subr.mxu1 %v205_v49  ;;  %805 = vmatpush3.msra.mxu0 %v157_v50 }
  0x6f   :  { %840 = vmatpush3.msra.mxu1 %v189_v51  ;;  %806 = vmatprep.subr.mxu0 %v172_v52 }
  0x70   :  { %841 = vmatprep.subr.mxu1 %v204_v53  ;;  %807 = vmatpush3.msra.mxu0 %v156_v54 }
  0x71   :  { %842 = vmatpush3.msra.mxu1 %v188_v55  ;;  %808 = vmatprep.subr.mxu0 %v171_v56  ;;  %v601_v56 = vld [vmem:[#allocation8 + $0x10] sm:$0xff] }
  0x72   :  { %843 = vmatprep.subr.mxu1 %v203_v57  ;;  %809 = vmatpush3.msra.mxu0 %v155_v58  ;;  %v600_v57 = vld [vmem:[#allocation8 + $0x8] sm:$0xff]  ;;  %v599_v58 = vld [vmem:[#allocation8] sm:$0xff] }
  0x73   :  { %844 = vmatpush3.msra.mxu1 %v187_v59  ;;  %810 = vmatprep.subr.mxu0 %v170_v60  ;;  %v710_v59 = vld [vmem:[%s1193_s4] ss:$0 sm:$0xff] }
  0x74   :  { %845 = vmatprep.subr.mxu1 %v202_v61  ;;  %811 = vmatpush3.msra.mxu0 %v154_v62 }
  0x75   :  { %846 = vmatpush3.msra.mxu1 %v186_v63  ;;  %812 = vmatprep.subr.mxu0 %v169_v0  ;;  %v711_v0 = vld [vmem:[%s1195_s6] ss:$0 sm:$0xff] }
  0x76   :  { %847 = vmatprep.subr.mxu1 %v201_v1  ;;  %813 = vmatpush3.msra.mxu0 %v153_v2 }
  0x77   :  { %427 = vmatprep.mubr.f32.mxu0 %v85_v3  ;;  %848 = vmatpush3.msra.mxu1 %v185_v4 }
  0x78   :  { %497 = vmatprep.mubr.f32.mxu1 %v87_v5  ;;  %428 = vmatmul.mubr.f32.vlgmr.msra.gmra.mxu0 %v84_v6 }
  0x79   :  { %498 = vmatmul.mubr.f32.vlgmr.msra.gmra.mxu1 %v86_v7  ;;  %886 = vmatprep.subr.mxu0 %v1079_v9 }
  0x7a   :  { %921 = vmatprep.subr.mxu1 %v1079_v9  ;;  %887 = vmatpush3.msra.mxu0 %v520_v8 }
  0x7b   :  { %888 = vmatprep.subr.mxu0 %v1079_v9  ;;  %918 = vmatprep.mubr.msk.f32.mxu0 %vm1080_vm0, %v1079_v9 }
  0x7c   :  { %889 = vmatpush3.msra.mxu0 %v519_v10  ;;  %953 = vmatprep.mubr.msk.f32.mxu1 %vm1080_vm0, %v1079_v9 }
  0x7d   :  { %890 = vmatprep.subr.mxu0 %v1079_v9  ;;  %922 = vmatpush3.msra.mxu1 %v614_v25 }
  0x7e   :  { %891 = vmatpush3.msra.mxu0 %v518_v11  ;;  %923 = vmatprep.subr.mxu1 %v1079_v9 }
  0x7f   :  { %892 = vmatprep.subr.mxu0 %v1079_v9  ;;  %924 = vmatpush3.msra.mxu1 %v613_v26 }
  0x80   :  { %893 = vmatpush3.msra.mxu0 %v517_v12  ;;  %925 = vmatprep.subr.mxu1 %v1079_v9 }
  0x81   :  { %894 = vmatprep.subr.mxu0 %v1079_v9  ;;  %926 = vmatpush3.msra.mxu1 %v612_v27 }
  0x82   :  { %895 = vmatpush3.msra.mxu0 %v516_v13  ;;  %927 = vmatprep.subr.mxu1 %v1079_v9 }
  0x83   :  { %896 = vmatprep.subr.mxu0 %v1079_v9  ;;  %928 = vmatpush3.msra.mxu1 %v611_v28 }
  0x84   :  { %897 = vmatpush3.msra.mxu0 %v515_v14  ;;  %929 = vmatprep.subr.mxu1 %v1079_v9 }
  0x85   :  { %898 = vmatprep.subr.mxu0 %v1079_v9  ;;  %930 = vmatpush3.msra.mxu1 %v610_v29 }
  0x86   :  { %899 = vmatpush3.msra.mxu0 %v514_v15  ;;  %931 = vmatprep.subr.mxu1 %v1079_v9 }
  0x87   :  { %900 = vmatprep.subr.mxu0 %v1079_v9  ;;  %932 = vmatpush3.msra.mxu1 %v609_v30 }
  0x88   :  { %901 = vmatpush3.msra.mxu0 %v513_v16  ;;  %933 = vmatprep.subr.mxu1 %v1079_v9 }
  0x89   :  { %902 = vmatprep.subr.mxu0 %v1079_v9  ;;  %934 = vmatpush3.msra.mxu1 %v608_v31 }
  0x8a   :  { %903 = vmatpush3.msra.mxu0 %v512_v17  ;;  %935 = vmatprep.subr.mxu1 %v1079_v9 }
  0x8b   :  { %904 = vmatprep.subr.mxu0 %v1079_v9  ;;  %936 = vmatpush3.msra.mxu1 %v607_v32 }
  0x8c   :  { %905 = vmatpush3.msra.mxu0 %v511_v18  ;;  %937 = vmatprep.subr.mxu1 %v1079_v9 }
  0x8d   :  { %906 = vmatprep.subr.mxu0 %v1079_v9  ;;  %938 = vmatpush3.msra.mxu1 %v606_v33 }
  0x8e   :  { %907 = vmatpush3.msra.mxu0 %v510_v19  ;;  %939 = vmatprep.subr.mxu1 %v1079_v9 }
  0x8f   :  { %908 = vmatprep.subr.mxu0 %v1079_v9  ;;  %940 = vmatpush3.msra.mxu1 %v605_v34 }
  0x90   :  { %909 = vmatpush3.msra.mxu0 %v509_v20  ;;  %941 = vmatprep.subr.mxu1 %v1079_v9 }
  0x91   :  { %910 = vmatprep.subr.mxu0 %v1079_v9  ;;  %942 = vmatpush3.msra.mxu1 %v604_v35 }
  0x92   :  { %911 = vmatpush3.msra.mxu0 %v508_v21  ;;  %943 = vmatprep.subr.mxu1 %v1079_v9 }
  0x93   :  { %912 = vmatprep.subr.mxu0 %v1079_v9  ;;  %944 = vmatpush3.msra.mxu1 %v603_v36 }
  0x94   :  { %913 = vmatpush3.msra.mxu0 %v507_v22  ;;  %945 = vmatprep.subr.mxu1 %v1079_v9 }
  0x95   :  { %914 = vmatprep.subr.mxu0 %v1079_v9  ;;  %946 = vmatpush3.msra.mxu1 %v602_v37 }
  0x96   :  { %915 = vmatpush3.msra.mxu0 %v506_v23  ;;  %947 = vmatprep.subr.mxu1 %v1079_v9 }
  0x97   :  { %916 = vmatprep.subr.mxu0 %v1079_v9  ;;  %948 = vmatpush3.msra.mxu1 %v601_v56 }
  0x98   :  { %917 = vmatpush3.msra.mxu0 %v505_v24  ;;  %949 = vmatprep.subr.mxu1 %v1079_v9 }
  0x99   :  { %950 = vmatpush3.msra.mxu1 %v600_v57 }
  0x9a   :  { %951 = vmatprep.subr.mxu1 %v1079_v9 }
  0x9b   :  { %952 = vmatpush3.msra.mxu1 %v599_v58 }
 0x116   :  { %v744_v38 = vpop.f32.mrf.mxu0 }
 0x118   :  { %v779_v39 = vpop.f32.mrf.mxu1  ;;  %v745_v40 = vpop.f32.mrf.mxu0 }
 0x119   :  { %v746_v41 = vadd.f32 %v745_v40, %v744_v38 }
 0x11a   :  { %v780_v43 = vpop.f32.mrf.mxu1 }
 0x11b   :  { %v290_v44 = vadd.f32 %v746_v41, %v709_v42  ;;  %v781_v45 = vadd.f32 %v780_v43, %v779_v39 }
 0x11d   :  { %v360_v50 = vadd.f32 %v781_v45, %v290_v44 }
 0x138   :  { %v814_v46 = vpop.f32.mrf.mxu0 }
 0x139   :  { %v849_v47 = vpop.f32.mrf.mxu1 }
 0x13a   :  { %v815_v48 = vpop.f32.mrf.mxu0 }
 0x13b   :  { %v850_v49 = vpop.f32.mrf.mxu1  ;;  %v816_v51 = vadd.f32 %v815_v48, %v814_v46 }
 0x13c   :  { %v851_v53 = vadd.f32 %v850_v49, %v849_v47 }
 0x13d   :  { %v430_v52 = vadd.f32 %v816_v51, %v360_v50 }
 0x13f   :  { %v500_v54 = vadd.f32 %v851_v53, %v430_v52 }
 0x141   :  { %v503_v55 = vmax.f32 %v500_v54, 0.0 }
 0x143   :  { %919 = vmatmul.mubr.f32.vlgmr.msra.gmra.mxu0 %v503_v55 }
 0x203   :  { %v593_v60 = vpop.f32.mrf.mxu0 }
 0x204   :  { %v594_v61 = vadd.f32 %v710_v59, %v593_v60 }
 0x205   :  { %v920_v62 = vpop.f32.mrf.mxu0 }
 0x206   :  { %v597_v63 = vmax.f32 %v594_v61, 0.0 }
 0x208   :  { %954 = vmatmul.mubr.f32.vlgmr.msra.gmra.mxu1 %v597_v63 }
 0x2c8   :  { %v687_v1 = vpop.f32.mrf.mxu1 }
 0x2c9   :  { %v688_v2 = vadd.f32 %v711_v0, %v687_v1 }
 0x2ca   :  { %v955_v3 = vpop.f32.mrf.mxu1 }
 0x2cb   :  { %691 = vst [vmem:[#allocation10] sm:$0xff] %v688_v2 }
 0x2cc   :  { %1056 = shalt.err (!%p1053_p10)
}
 0x2cd   :  { %701 = dma.vmem_to_hbm [thread:$0]  %s699_s25, 128, %s1196_s7, [#allocation4]  }
 0x2ce   :  { %1071 = dma.done.wait [#allocation4], 128  }
 0x2cf   :  { %1072 = vsyncadd [#allocation4], 4294967168 }
 0x2d0   :  { %705 = vsyncpa [#allocation3], 1 }
 0x2d1   :  { %706 = vsyncpa [#allocation6], 1 }
 0x2d2   :  { %707 = vsyncpa [#allocation9], 1 }
 0x2d3   :  { %708 = vsyncpa [#allocation4], 1 }

</bundles_post_ra>
